<compile_context>
chip_gen: v7x
topology: tpu7x:2x2x1
jax: 0.10.0
libtpu: 0.0.40
codegen_flags: <defaults>
</compile_context>

<pallas_src>
import functools
import numpy as np

import jax
import jax.numpy as jnp
from jax import lax
from jax.experimental import pallas as pl
from jax.experimental.pallas import tpu as pltpu

EPS = 1e-5                          # PyTorch GroupNorm default eps
VMEM_LIMIT = 48 * 1024 * 1024       # explicit scoped-VMEM cap (safe on v5e/v6e/v7x)
_REF_PREC = lax.Precision.HIGHEST   # reference only


# --------------------------------------------------------------------------
# In-kernel helpers
# --------------------------------------------------------------------------
def _activated_padded_slab(xt_ref, xm_ref, xb_ref, ss_ref):
    """Build the ((TH+2)*W, C) GroupNorm+SiLU-activated slab for one row tile.

    xt_ref/xb_ref are clamped 1-row halo views; at the image top/bottom the halo
    rows are zeroed AFTER activation (matching 'same' zero padding of the conv
    input, which in the torch module is silu(gn(x)) zero-padded)."""
    _, TH, W, C = xm_ref.shape
    j = pl.program_id(1)
    last = pl.num_programs(1) - 1

    top = xt_ref[...].reshape(W, C)
    mid = xm_ref[...].reshape(TH * W, C)
    bot = xb_ref[...].reshape(W, C)
    a = jnp.concatenate([top, mid, bot], axis=0)          # ((TH+2)*W, C) f32

    ss = ss_ref[0]                                        # (2, C): [scale, shift]
    a = a * ss[0:1, :] + ss[1:2, :]                       # GroupNorm as per-channel affine
    a = a * jax.nn.sigmoid(a)                             # SiLU (sigmoid on the EUP)

    r_total = (TH + 2) * W
    rid = lax.broadcasted_iota(jnp.int32, (r_total, 1), 0)
    bad = jnp.logical_or(jnp.logical_and(rid < W, j == 0),
                         jnp.logical_and(rid >= (TH + 1) * W, j == last))
    return jnp.where(bad, 0.0, a)                         # f32


def _conv_tile(xt_ref, xm_ref, xb_ref, ss_ref, w_ref, b_ref):
    """Fused GroupNorm->SiLU->3x3 'same' conv for one (TH, W) row tile.

    The kx taps are produced with pltpu.roll (XLU, non-negative shifts) + column masks
    and folded into the contraction: per ky one (TH*W, 3C) x (3C, Cout) bf16 dot with
    f32 accumulation."""
    _, TH, W, C = xm_ref.shape
    cout = w_ref.shape[-1]

    a = _activated_padded_slab(xt_ref, xm_ref, xb_ref, ss_ref)
    r_total = (TH + 2) * W
    col = lax.broadcasted_iota(jnp.int32, (r_total, 1), 0) % W
    # left[i]  = a[i-1] (== x[.., w-1]) with zero at w == 0
    left = jnp.where(col == 0, 0.0, pltpu.roll(a, shift=1, axis=0))
    # right[i] = a[i+1] (== x[.., w+1]) with zero at w == W-1.
    # pltpu.roll needs a non-negative shift: roll by (r_total - 1) == roll by -1 (mod r_total).
    right = jnp.where(col == W - 1, 0.0, pltpu.roll(a, shift=r_total - 1, axis=0))

    acc = jnp.zeros((TH * W, cout), jnp.float32)
    for ky in range(3):
        lo = ky * W
        hi = lo + TH * W
        patch = jnp.concatenate([left[lo:hi], a[lo:hi], right[lo:hi]], axis=-1)  # (TH*W, 3C)
        acc = acc + jnp.dot(patch.astype(jnp.bfloat16), w_ref[ky],
                            preferred_element_type=jnp.float32)
    return acc + b_ref[...]                               # (TH*W, Cout) f32


def _channel_moments(v):
    """Per-channel [sum, sum-of-squares] of a (rows, C) slab -> (2, C)."""
    return jnp.concatenate([jnp.sum(v, axis=0, keepdims=True),
                            jnp.sum(v * v, axis=0, keepdims=True)], axis=0)


# --------------------------------------------------------------------------
# Pallas kernels
# --------------------------------------------------------------------------
def _channel_sums_kernel(x_ref, o_ref):
    """Per-channel sum / sumsq of x, accumulated over the row-tile grid axis."""
    _, TH, W, C = x_ref.shape
    x = x_ref[...].reshape(TH * W, C)
    part = _channel_moments(x).reshape(1, 2, C)
    j = pl.program_id(1)

    @pl.when(j == 0)
    def _init():
        o_ref[...] = part

    @pl.when(j > 0)
    def _acc():
        o_ref[...] = o_ref[...] + part


def _fused_conv_stats_kernel(xt, xm, xb, ss, w, b, o_ref, st_ref):
    """in_layers: GN->SiLU->conv3x3; also accumulates per-channel stats of the output
    (these feed the second GroupNorm, so h1 is never re-read from HBM for stats)."""
    _, TH, W, _ = xm.shape
    cout = w.shape[-1]
    h = _conv_tile(xt, xm, xb, ss, w, b)
    o_ref[...] = h.reshape(1, TH, W, cout)

    part = _channel_moments(h).reshape(1, 2, cout)
    j = pl.program_id(1)

    @pl.when(j == 0)
    def _init():
        st_ref[...] = part

    @pl.when(j > 0)
    def _acc():
        st_ref[...] = st_ref[...] + part


def _fused_conv_res_kernel(xt, xm, xb, ss, w, b, r_ref, o_ref):
    """out_layers: GN(+emb folded into shift)->SiLU->conv3x3 fused with the Identity skip add."""
    _, TH, W, _ = xm.shape
    cout = w.shape[-1]
    h = _conv_tile(xt, xm, xb, ss, w, b)
    o_ref[...] = (h + r_ref[...].reshape(TH * W, cout)).reshape(1, TH, W, cout)


def _silu_linear_kernel(e_ref, w_ref, b_ref, o_ref):
    """emb_layers: SiLU -> Linear(emb_channels, out_channels)."""
    e = e_ref[...]
    e = e * jax.nn.sigmoid(e)
    o_ref[...] = jnp.dot(e.astype(jnp.bfloat16), w_ref[...],
                         preferred_element_type=jnp.float32) + b_ref[...]


# --------------------------------------------------------------------------
# pallas_call wrappers
# --------------------------------------------------------------------------
def channel_sums(x, row_tile):
    N, H, W, C = x.shape
    nj = H // row_tile
    return pl.pallas_call(
        _channel_sums_kernel,
        out_shape=jax.ShapeDtypeStruct((N, 2, C), jnp.float32),
        grid=(N, nj),
        in_specs=[pl.BlockSpec((1, row_tile, W, C), lambda n, j: (n, j, 0, 0))],
        out_specs=pl.BlockSpec((1, 2, C), lambda n, j: (n, 0, 0)),
        compiler_params=pltpu.CompilerParams(
            dimension_semantics=("parallel", "arbitrary"),
            vmem_limit_bytes=VMEM_LIMIT),
    )(x)


def _conv_in_specs(H, W, C, cout, TH):
    # x is passed three times: a 1-row top-halo view (clamped at the image edge),
    # the main row tile, and a 1-row bottom-halo view.  All auto-pipelined.
    return [
        pl.BlockSpec((1, 1, W, C), lambda n, j: (n, jnp.maximum(j * TH - 1, 0), 0, 0)),
        pl.BlockSpec((1, TH, W, C), lambda n, j: (n, j, 0, 0)),
        pl.BlockSpec((1, 1, W, C), lambda n, j: (n, jnp.minimum(j * TH + TH, H - 1), 0, 0)),
        pl.BlockSpec((1, 2, C), lambda n, j: (n, 0, 0)),           # per-channel scale/shift
        pl.BlockSpec((3, 3 * C, cout), lambda n, j: (0, 0, 0)),    # packed bf16 conv weight
        pl.BlockSpec((1, cout), lambda n, j: (0, 0)),              # bias
    ]


def fused_gn_silu_conv_stats(x, ss, w_packed, b, row_tile):
    N, H, W, C = x.shape
    cout = w_packed.shape[-1]
    nj = H // row_tile
    return pl.pallas_call(
        _fused_conv_stats_kernel,
        out_shape=(jax.ShapeDtypeStruct((N, H, W, cout), jnp.float32),
                   jax.ShapeDtypeStruct((N, 2, cout), jnp.float32)),
        grid=(N, nj),
        in_specs=_conv_in_specs(H, W, C, cout, row_tile),
        out_specs=(pl.BlockSpec((1, row_tile, W, cout), lambda n, j: (n, j, 0, 0)),
                   pl.BlockSpec((1, 2, cout), lambda n, j: (n, 0, 0))),
        compiler_params=pltpu.CompilerParams(
            dimension_semantics=("parallel", "arbitrary"),
            vmem_limit_bytes=VMEM_LIMIT),
    )(x, x, x, ss, w_packed, b.reshape(1, cout))


def fused_gn_silu_conv_residual(x, ss, w_packed, b, residual, row_tile):
    N, H, W, C = x.shape
    cout = w_packed.shape[-1]
    nj = H // row_tile
    in_specs = _conv_in_specs(H, W, C, cout, row_tile)
    in_specs.append(pl.BlockSpec((1, row_tile, W, cout), lambda n, j: (n, j, 0, 0)))
    return pl.pallas_call(
        _fused_conv_res_kernel,
        out_shape=jax.ShapeDtypeStruct((N, H, W, cout), jnp.float32),
        grid=(N, nj),
        in_specs=in_specs,
        out_specs=pl.BlockSpec((1, row_tile, W, cout), lambda n, j: (n, j, 0, 0)),
        compiler_params=pltpu.CompilerParams(
            dimension_semantics=("parallel", "parallel"),
            vmem_limit_bytes=VMEM_LIMIT),
    )(x, x, x, ss, w_packed, b.reshape(1, cout), residual)


def silu_linear(emb, w_bf16, b):
    N = emb.shape[0]
    C = w_bf16.shape[-1]
    # whole arrays are tiny -> no grid
    return pl.pallas_call(
        _silu_linear_kernel,
        out_shape=jax.ShapeDtypeStruct((N, C), jnp.float32),
    )(emb, w_bf16, b.reshape(1, C))


# --------------------------------------------------------------------------
# Tiny (N, 2, C) GroupNorm finalize (plain-JAX glue; negligible data volume)
# --------------------------------------------------------------------------
def _scale_shift_from_sums(sums, gamma, beta, emb_out, hw, groups):
    """Turn per-channel [sum, sumsq] of h (plus optional per-channel emb_out that is
    added to h before normalization) into per-channel GroupNorm scale/shift such that
    GN(h + e) = h * scale + shift."""
    N, _, C = sums.shape
    cg = C // groups
    s1 = sums[:, 0, :]
    s2 = sums[:, 1, :]
    e = jnp.zeros_like(s1) if emb_out is None else emb_out
    sum_c = s1 + hw * e
    sq_c = s2 + 2.0 * e * s1 + hw * (e * e)
    cnt = float(hw * cg)
    mean_g = sum_c.reshape(N, groups, cg).sum(-1) / cnt
    msq_g = sq_c.reshape(N, groups, cg).sum(-1) / cnt
    var_g = msq_g - mean_g * mean_g
    rstd_g = lax.rsqrt(var_g + EPS)
    mean_c = jnp.repeat(mean_g, cg, axis=1)
    rstd_c = jnp.repeat(rstd_g, cg, axis=1)
    scale = gamma[None, :] * rstd_c
    shift = (e - mean_c) * scale + beta[None, :]
    return jnp.stack([scale, shift], axis=1)               # (N, 2, C)


def _pick_row_tile(H, W, C, target_bytes=2 << 20):
    """Largest divisor of H whose (rows, W, C) f32 slab stays under ~2 MiB."""
    best = 1
    for th in range(1, H + 1):
        if H % th == 0 and th * W * C * 4 <= target_bytes:
            best = th
    return best


# --------------------------------------------------------------------------
# ResBlock forward (NHWC)
# --------------------------------------------------------------------------
def res_block_forward(x, emb, params, groups=32, row_tile=None):
    """x: (N, H, W, C) float32 NHWC, emb: (N, emb_channels) -> (N, H, W, C).

    Conv weights are HWIO.  Works natively in NHWC (no boundary transposes);
    wrap with jnp.transpose at call sites that require NCHW."""
    N, H, W, C = x.shape
    th = row_tile if row_tile is not None else _pick_row_tile(H, W, C)
    assert H % th == 0, "row_tile must divide H"

    w1 = params["conv1_w"].reshape(3, 3 * C, -1).astype(jnp.bfloat16)
    cout = w1.shape[-1]
    assert cout == C, "implemented config: out_channels == channels (Identity skip)"
    w2 = params["conv2_w"].reshape(3, 3 * cout, cout).astype(jnp.bfloat16)

    # in_layers[0:2] statistics (single read of x), finalized to per-channel scale/shift
    sums1 = channel_sums(x, th)
    ss1 = _scale_shift_from_sums(sums1, params["gn1_gamma"], params["gn1_beta"],
                                 None, H * W, groups)

    # emb_layers: SiLU -> Linear
    emb_out = silu_linear(emb, params["emb_w"].astype(jnp.bfloat16), params["emb_b"])

    # in_layers fused: GN1 -> SiLU -> conv3x3 (+ per-channel stats of h for GN2)
    h, sums2 = fused_gn_silu_conv_stats(x, ss1, w1, params["conv1_b"], th)

    # out_layers GN: the "+ emb_out" of the torch module is folded into the shift
    ss2 = _scale_shift_from_sums(sums2, params["gn2_gamma"], params["gn2_beta"],
                                 emb_out, H * W, groups)

    # TODO(synk): nn.Dropout is treated as identity (eval-mode semantics); no in-kernel RNG dropout.
    # out_layers fused: GN2 -> SiLU -> conv3x3, plus the Identity skip-connection add
    return fused_gn_silu_conv_residual(h, ss2, w2, params["conv2_b"], x, th)


# --------------------------------------------------------------------------
# Pure-JAX f32 reference (NCHW, like the PyTorch module) for correctness check
# --------------------------------------------------------------------------
def _ref_forward(x_nchw, emb, params, groups):
    def gn(v, gamma, beta):
        N, C, H, W = v.shape
        vg = v.reshape(N, groups, C // groups, H, W)
        mean = vg.mean(axis=(2, 3, 4), keepdims=True)
        var = ((vg - mean) ** 2).mean(axis=(2, 3, 4), keepdims=True)
        vn = ((vg - mean) / jnp.sqrt(var + EPS)).reshape(N, C, H, W)
        return vn * gamma[None, :, None, None] + beta[None, :, None, None]

    def silu(v):
        return v * jax.nn.sigmoid(v)

    def conv(v, w_hwio, b):
        y = lax.conv_general_dilated(
            v, w_hwio, window_strides=(1, 1), padding=((1, 1), (1, 1)),
            dimension_numbers=("NCHW", "HWIO", "NCHW"), precision=_REF_PREC)
        return y + b[None, :, None, None]

    h = conv(silu(gn(x_nchw, params["gn1_gamma"], params["gn1_beta"])),
             params["conv1_w"], params["conv1_b"])
    e = jnp.dot(silu(emb), params["emb_w"], precision=_REF_PREC) + params["emb_b"]
    h = h + e[:, :, None, None]
    h = conv(silu(gn(h, params["gn2_gamma"], params["gn2_beta"])),
             params["conv2_w"], params["conv2_b"])
    return x_nchw + h


# --------------------------------------------------------------------------
if __name__ == "__main__":
    # normalization() is GroupNorm(32, channels) -> channels must be a multiple of 32.
    N, C, H, W = 2, 32, 16, 16
    EMB = 128
    GROUPS = 32
    ROW_TILE = 4   # force a multi-tile spatial grid so halo / accumulation paths are exercised

    key = jax.random.PRNGKey(0)
    ks = jax.random.split(key, 12)
    x_nhwc = jax.random.normal(ks[0], (N, H, W, C), jnp.float32)
    emb = jax.random.normal(ks[1], (N, EMB), jnp.float32)

    params = {
        "gn1_gamma": 1.0 + 0.1 * jax.random.normal(ks[2], (C,), jnp.float32),
        "gn1_beta": 0.1 * jax.random.normal(ks[3], (C,), jnp.float32),
        "conv1_w": 0.05 * jax.random.normal(ks[4], (3, 3, C, C), jnp.float32),   # HWIO
        "conv1_b": 0.05 * jax.random.normal(ks[5], (C,), jnp.float32),
        "emb_w": 0.05 * jax.random.normal(ks[6], (EMB, C), jnp.float32),
        "emb_b": 0.05 * jax.random.normal(ks[7], (C,), jnp.float32),
        "gn2_gamma": 1.0 + 0.1 * jax.random.normal(ks[8], (C,), jnp.float32),
        "gn2_beta": 0.1 * jax.random.normal(ks[9], (C,), jnp.float32),
        # zero_module() zeros this conv in the torch __init__; random values here so the
        # fused kernel path is actually exercised.
        "conv2_w": 0.05 * jax.random.normal(ks[10], (3, 3, C, C), jnp.float32),  # HWIO
        "conv2_b": 0.05 * jax.random.normal(ks[11], (C,), jnp.float32),
    }

    fwd = jax.jit(functools.partial(res_block_forward, groups=GROUPS, row_tile=ROW_TILE))
    out = jax.block_until_ready(fwd(x_nhwc, emb, params))

    # f32 reference computed in the module's original NCHW layout.
    x_nchw = jnp.transpose(x_nhwc, (0, 3, 1, 2))
    ref = jnp.transpose(_ref_forward(x_nchw, emb, params, GROUPS), (0, 2, 3, 1))
    assert out.shape == (N, H, W, C)
    # Kernel MXU dots use bf16 inputs with f32 accumulation, so the comparison against
    # the f32 reference uses a bf16-appropriate tolerance.
    np.testing.assert_allclose(np.asarray(out), np.asarray(ref), rtol=2e-2, atol=2e-2)
    print("KERNEL_OK")
</pallas_src>

<mosaic_0001>
module attributes {stable_mosaic.version = 11 : i64} {
  func.func @_channel_sums_kernel(%arg0: i32, %arg1: i32, %arg2: memref<1x4x16x32xf32, #tpu.memory_space<vmem>>, %arg3: memref<1x2x32xf32, #tpu.memory_space<vmem>>) attributes {dimension_semantics = [#tpu.dimension_semantics<parallel>, #tpu.dimension_semantics<arbitrary>], iteration_bounds = array<i64: 2, 4>, scalar_prefetch = 0 : i64, scratch_operands = 0 : i64, tpu.core_type = #tpu.core_type<tc>, window_params = [{transform_indices = @transform_0, window_bounds = array<i64: 1, 4, 16, 32>}, {transform_indices = @transform_1, window_bounds = array<i64: 1, 2, 32>}]} {
    %c0 = arith.constant 0 : index
    %c0_0 = arith.constant 0 : index
    %c0_1 = arith.constant 0 : index
    %c0_2 = arith.constant 0 : index
    %0 = vector.load %arg2[%c0, %c0_0, %c0_1, %c0_2] : memref<1x4x16x32xf32, #tpu.memory_space<vmem>>, vector<1x4x16x32xf32>
    %1 = vector.shape_cast %0 : vector<1x4x16x32xf32> to vector<64x32xf32>
    %cst = arith.constant dense<0.000000e+00> : vector<32xf32>
    %2 = vector.multi_reduction <add>, %1, %cst [0] : vector<64x32xf32> to vector<32xf32>
    %3 = vector.shape_cast %2 : vector<32xf32> to vector<1x32xf32>
    %4 = arith.mulf %1, %1 : vector<64x32xf32>
    %cst_3 = arith.constant dense<0.000000e+00> : vector<32xf32>
    %5 = vector.multi_reduction <add>, %4, %cst_3 [0] : vector<64x32xf32> to vector<32xf32>
    %6 = vector.shape_cast %5 : vector<32xf32> to vector<1x32xf32>
    %7 = tpu.concatenate %3, %6 in 0 : vector<1x32xf32>, vector<1x32xf32> -> vector<2x32xf32>
    %8 = vector.shape_cast %7 : vector<2x32xf32> to vector<1x2x32xf32>
    %c0_i32 = arith.constant 0 : i32
    %9 = arith.cmpi eq, %arg1, %c0_i32 : i32
    %10 = arith.extui %9 : i1 to i32
    %c0_i32_4 = arith.constant 0 : i32
    %11 = arith.cmpi ne, %10, %c0_i32_4 : i32
    scf.if %11 {
      %c0_7 = arith.constant 0 : index
      %c0_8 = arith.constant 0 : index
      %c0_9 = arith.constant 0 : index
      %15 = vector.load %arg3[%c0_7, %c0_8, %c0_9] : memref<1x2x32xf32, #tpu.memory_space<vmem>>, vector<1x2x32xf32>
      tpu.vector_store %arg3[%c0_7, %c0_8, %c0_9], %8 {strides = array<i32>} : memref<1x2x32xf32, #tpu.memory_space<vmem>>, vector<1x2x32xf32>,
    } else {
    }
    %c0_i32_5 = arith.constant 0 : i32
    %12 = arith.cmpi sgt, %arg1, %c0_i32_5 : i32
    %13 = arith.extui %12 : i1 to i32
    %c0_i32_6 = arith.constant 0 : i32
    %14 = arith.cmpi ne, %13, %c0_i32_6 : i32
    scf.if %14 {
      %c0_7 = arith.constant 0 : index
      %c0_8 = arith.constant 0 : index
      %c0_9 = arith.constant 0 : index
      %15 = vector.load %arg3[%c0_7, %c0_8, %c0_9] : memref<1x2x32xf32, #tpu.memory_space<vmem>>, vector<1x2x32xf32>
      %16 = arith.addf %15, %8 : vector<1x2x32xf32>
      %c0_10 = arith.constant 0 : index
      %c0_11 = arith.constant 0 : index
      %c0_12 = arith.constant 0 : index
      %17 = vector.load %arg3[%c0_10, %c0_11, %c0_12] : memref<1x2x32xf32, #tpu.memory_space<vmem>>, vector<1x2x32xf32>
      tpu.vector_store %arg3[%c0_10, %c0_11, %c0_12], %16 {strides = array<i32>} : memref<1x2x32xf32, #tpu.memory_space<vmem>>, vector<1x2x32xf32>,
    } else {
    }
    return
  }
  func.func @transform_0(%arg0: i32, %arg1: i32) -> (i32, i32, i32, i32) {
    %c0_i32 = arith.constant 0 : i32
    %c0_i32_0 = arith.constant 0 : i32
    %c0_i32_1 = arith.constant 0 : i32
    return %arg0, %arg1, %c0_i32, %c0_i32_0 : i32, i32, i32, i32
  }
  func.func @transform_1(%arg0: i32, %arg1: i32) -> (i32, i32, i32) {
    %c0_i32 = arith.constant 0 : i32
    %c0_i32_0 = arith.constant 0 : i32
    %c0_i32_1 = arith.constant 0 : i32
    return %arg0, %c0_i32, %c0_i32_0 : i32, i32, i32
  }
}

module attributes {stable_mosaic.version = 11 : i64} {
  func.func @_silu_linear_kernel(%arg0: memref<2x128xf32, #tpu.memory_space<vmem>>, %arg1: memref<128x32xbf16, #tpu.memory_space<vmem>>, %arg2: memref<1x32xf32, #tpu.memory_space<vmem>>, %arg3: memref<2x32xf32, #tpu.memory_space<vmem>>) attributes {dimension_semantics = [], scalar_prefetch = 0 : i64, scratch_operands = 0 : i64, tpu.core_type = #tpu.core_type<tc>} {
    %c0 = arith.constant 0 : index
    %c0_0 = arith.constant 0 : index
    %0 = vector.load %arg0[%c0, %c0_0] : memref<2x128xf32, #tpu.memory_space<vmem>>, vector<2x128xf32>
    %1 = arith.negf %0 : vector<2x128xf32>
    %2 = math.exp %1 : vector<2x128xf32>
    %cst = arith.constant 1.000000e+00 : f32
    %3 = vector.broadcast %cst : f32 to vector<2x128xf32>
    %4 = arith.addf %3, %2 : vector<2x128xf32>
    %5 = arith.divf %3, %4 : vector<2x128xf32>
    %6 = arith.mulf %0, %5 : vector<2x128xf32>
    %7 = arith.truncf %6 : vector<2x128xf32> to vector<2x128xbf16>
    %c0_1 = arith.constant 0 : index
    %c0_2 = arith.constant 0 : index
    %8 = vector.load %arg1[%c0_1, %c0_2] : memref<128x32xbf16, #tpu.memory_space<vmem>>, vector<128x32xbf16>
    %cst_3 = arith.constant dense<0.000000e+00> : vector<2x32xf32>
    %9 = tpu.matmul %7, %8, %cst_3 {dimension_numbers = #tpu.dot_dimension_numbers<[1], [0], [0], [1], [0, 0, 1, 1], [], []>} : vector<2x128xbf16>, vector<128x32xbf16>, vector<2x32xf32> -> vector<2x32xf32>
    %c0_4 = arith.constant 0 : index
    %c0_5 = arith.constant 0 : index
    %10 = vector.load %arg2[%c0_4, %c0_5] : memref<1x32xf32, #tpu.memory_space<vmem>>, vector<1x32xf32>
    %11 = vector.broadcast %10 : vector<1x32xf32> to vector<2x32xf32>
    %12 = arith.addf %9, %11 : vector<2x32xf32>
    %c0_6 = arith.constant 0 : index
    %c0_7 = arith.constant 0 : index
    %13 = vector.load %arg3[%c0_6, %c0_7] : memref<2x32xf32, #tpu.memory_space<vmem>>, vector<2x32xf32>
    tpu.vector_store %arg3[%c0_6, %c0_7], %12 {strides = array<i32>} : memref<2x32xf32, #tpu.memory_space<vmem>>, vector<2x32xf32>,
    return
  }
}

module attributes {stable_mosaic.version = 11 : i64} {
  func.func @_fused_conv_stats_kernel(%arg0: i32, %arg1: i32, %arg2: memref<1x1x16x32xf32, #tpu.memory_space<vmem>>, %arg3: memref<1x4x16x32xf32, #tpu.memory_space<vmem>>, %arg4: memref<1x1x16x32xf32, #tpu.memory_space<vmem>>, %arg5: memref<1x2x32xf32, #tpu.memory_space<vmem>>, %arg6: memref<3x96x32xbf16, #tpu.memory_space<vmem>>, %arg7: memref<1x32xf32, #tpu.memory_space<vmem>>, %arg8: memref<1x4x16x32xf32, #tpu.memory_space<vmem>>, %arg9: memref<1x2x32xf32, #tpu.memory_space<vmem>>) attributes {dimension_semantics = [#tpu.dimension_semantics<parallel>, #tpu.dimension_semantics<arbitrary>], iteration_bounds = array<i64: 2, 4>, scalar_prefetch = 0 : i64, scratch_operands = 0 : i64, tpu.core_type = #tpu.core_type<tc>, window_params = [{transform_indices = @transform_0, window_bounds = array<i64: 1, 1, 16, 32>}, {transform_indices = @transform_1, window_bounds = array<i64: 1, 4, 16, 32>}, {transform_indices = @transform_2, window_bounds = array<i64: 1, 1, 16, 32>}, {transform_indices = @transform_3, window_bounds = array<i64: 1, 2, 32>}, {pipeline_mode = #tpu.pipeline_mode<synchronous>, transform_indices = @transform_4, window_bounds = array<i64: 3, 96, 32>}, {pipeline_mode = #tpu.pipeline_mode<synchronous>, transform_indices = @transform_5, window_bounds = array<i64: 1, 32>}, {transform_indices = @transform_6, window_bounds = array<i64: 1, 4, 16, 32>}, {transform_indices = @transform_7, window_bounds = array<i64: 1, 2, 32>}]} {
    %c0 = arith.constant 0 : index
    %c0_0 = arith.constant 0 : index
    %c0_1 = arith.constant 0 : index
    %c0_2 = arith.constant 0 : index
    %0 = vector.load %arg2[%c0, %c0_0, %c0_1, %c0_2] : memref<1x1x16x32xf32, #tpu.memory_space<vmem>>, vector<1x1x16x32xf32>
    %1 = vector.shape_cast %0 : vector<1x1x16x32xf32> to vector<16x32xf32>
    %c0_3 = arith.constant 0 : index
    %c0_4 = arith.constant 0 : index
    %c0_5 = arith.constant 0 : index
    %c0_6 = arith.constant 0 : index
    %2 = vector.load %arg3[%c0_3, %c0_4, %c0_5, %c0_6] : memref<1x4x16x32xf32, #tpu.memory_space<vmem>>, vector<1x4x16x32xf32>
    %3 = vector.shape_cast %2 : vector<1x4x16x32xf32> to vector<64x32xf32>
    %c0_7 = arith.constant 0 : index
    %c0_8 = arith.constant 0 : index
    %c0_9 = arith.constant 0 : index
    %c0_10 = arith.constant 0 : index
    %4 = vector.load %arg4[%c0_7, %c0_8, %c0_9, %c0_10] : memref<1x1x16x32xf32, #tpu.memory_space<vmem>>, vector<1x1x16x32xf32>
    %5 = vector.shape_cast %4 : vector<1x1x16x32xf32> to vector<16x32xf32>
    %6 = tpu.concatenate %1, %3, %5 in 0 : vector<16x32xf32>, vector<64x32xf32>, vector<16x32xf32> -> vector<96x32xf32>
    %c0_11 = arith.constant 0 : index
    %c0_12 = arith.constant 0 : index
    %c0_13 = arith.constant 0 : index
    %7 = vector.load %arg5[%c0_11, %c0_12, %c0_13] : memref<1x2x32xf32, #tpu.memory_space<vmem>>, vector<1x2x32xf32>
    %8 = vector.shape_cast %7 : vector<1x2x32xf32> to vector<2x32xf32>
    %9 = vector.extract_strided_slice %8 {offsets = [0, 0], sizes = [1, 32], strides = [1, 1]} : vector<2x32xf32> to vector<1x32xf32>
    %10 = vector.broadcast %9 : vector<1x32xf32> to vector<96x32xf32>
    %11 = arith.mulf %6, %10 : vector<96x32xf32>
    %12 = vector.extract_strided_slice %8 {offsets = [1, 0], sizes = [1, 32], strides = [1, 1]} : vector<2x32xf32> to vector<1x32xf32>
    %13 = vector.broadcast %12 : vector<1x32xf32> to vector<96x32xf32>
    %14 = arith.addf %11, %13 : vector<96x32xf32>
    %15 = arith.negf %14 : vector<96x32xf32>
    %16 = math.exp %15 : vector<96x32xf32>
    %cst = arith.constant 1.000000e+00 : f32
    %17 = vector.broadcast %cst : f32 to vector<96x32xf32>
    %18 = arith.addf %17, %16 : vector<96x32xf32>
    %19 = arith.divf %17, %18 : vector<96x32xf32>
    %20 = arith.mulf %14, %19 : vector<96x32xf32>
    %21 = tpu.iota {dimensions = array<i32: 0>} : vector<96x1xi32>
    %c16_i32 = arith.constant 16 : i32
    %22 = vector.broadcast %c16_i32 : i32 to vector<96x1xi32>
    %23 = arith.cmpi slt, %21, %22 : vector<96x1xi32>
    %c0_i32 = arith.constant 0 : i32
    %24 = arith.cmpi eq, %arg1, %c0_i32 : i32
    %25 = vector.broadcast %24 : i1 to vector<96x1xi1>
    %26 = arith.andi %23, %25 : vector<96x1xi1>
    %c80_i32 = arith.constant 80 : i32
    %27 = vector.broadcast %c80_i32 : i32 to vector<96x1xi32>
    %28 = arith.cmpi sge, %21, %27 : vector<96x1xi32>
    %c3_i32 = arith.constant 3 : i32
    %29 = arith.cmpi eq, %arg1, %c3_i32 : i32
    %30 = vector.broadcast %29 : i1 to vector<96x1xi1>
    %31 = arith.andi %28, %30 : vector<96x1xi1>
    %32 = arith.ori %26, %31 : vector<96x1xi1>
    %cst_14 = arith.constant 0.000000e+00 : f32
    %33 = vector.shape_cast %32 : vector<96x1xi1> to vector<96x1xi1>
    %34 = vector.broadcast %33 : vector<96x1xi1> to vector<96x32xi1>
    %35 = vector.broadcast %cst_14 : f32 to vector<96x32xf32>
    %36 = arith.select %34, %35, %20 : vector<96x32xi1>, vector<96x32xf32>
    %37 = tpu.iota {dimensions = array<i32: 0>} : vector<96x1xi32>
    %c16_i32_15 = arith.constant 16 : i32
    %c0_i32_16 = arith.constant 0 : i32
    %38 = arith.cmpi eq, %c16_i32_15, %c0_i32_16 : i32
    %c1_i32 = arith.constant 1 : i32
    %39 = arith.select %38, %c1_i32, %c16_i32_15 : i32
    %40 = vector.broadcast %39 : i32 to vector<96x1xi32>
    %41 = arith.remsi %37, %40 : vector<96x1xi32>
    %c0_i32_17 = arith.constant 0 : i32
    %42 = vector.broadcast %c0_i32_17 : i32 to vector<96x1xi32>
    %43 = arith.cmpi ne, %41, %42 : vector<96x1xi32>
    %c0_i32_18 = arith.constant 0 : i32
    %44 = vector.broadcast %c0_i32_18 : i32 to vector<96x1xi32>
    %45 = arith.cmpi slt, %41, %44 : vector<96x1xi32>
    %c0_i32_19 = arith.constant 0 : i32
    %46 = arith.cmpi slt, %39, %c0_i32_19 : i32
    %47 = vector.broadcast %46 : i1 to vector<96x1xi1>
    %48 = vector.broadcast %47 : vector<96x1xi1> to vector<96x1xi1>
    %49 = arith.xori %45, %48 : vector<96x1xi1>
    %50 = arith.andi %49, %43 : vector<96x1xi1>
    %51 = vector.broadcast %39 : i32 to vector<96x1xi32>
    %52 = arith.addi %41, %51 : vector<96x1xi32>
    %53 = arith.select %50, %52, %41 : vector<96x1xi1>, vector<96x1xi32>
    %c0_i32_20 = arith.constant 0 : i32
    %54 = vector.broadcast %c0_i32_20 : i32 to vector<96x1xi32>
    %55 = arith.cmpi eq, %53, %54 : vector<96x1xi32>
    %c1_i32_21 = arith.constant 1 : i32
    %56 = tpu.dynamic_rotate %36 by %c1_i32_21 dim 0 : vector<96x32xf32>, i32 -> vector<96x32xf32>
    %cst_22 = arith.constant 0.000000e+00 : f32
    %57 = vector.shape_cast %55 : vector<96x1xi1> to vector<96x1xi1>
    %58 = vector.broadcast %57 : vector<96x1xi1> to vector<96x32xi1>
    %59 = vector.broadcast %cst_22 : f32 to vector<96x32xf32>
    %60 = arith.select %58, %59, %56 : vector<96x32xi1>, vector<96x32xf32>
    %c15_i32 = arith.constant 15 : i32
    %61 = vector.broadcast %c15_i32 : i32 to vector<96x1xi32>
    %62 = arith.cmpi eq, %53, %61 : vector<96x1xi32>
    %c95_i32 = arith.constant 95 : i32
    %63 = tpu.dynamic_rotate %36 by %c95_i32 dim 0 : vector<96x32xf32>, i32 -> vector<96x32xf32>
    %cst_23 = arith.constant 0.000000e+00 : f32
    %64 = vector.shape_cast %62 : vector<96x1xi1> to vector<96x1xi1>
    %65 = vector.broadcast %64 : vector<96x1xi1> to vector<96x32xi1>
    %66 = vector.broadcast %cst_23 : f32 to vector<96x32xf32>
    %67 = arith.select %65, %66, %63 : vector<96x32xi1>, vector<96x32xf32>
    %cst_24 = arith.constant 0.000000e+00 : f32
    %68 = vector.broadcast %cst_24 : f32 to vector<64x32xf32>
    %69 = vector.extract_strided_slice %60 {offsets = [0, 0], sizes = [64, 32], strides = [1, 1]} : vector<96x32xf32> to vector<64x32xf32>
    %70 = vector.extract_strided_slice %36 {offsets = [0, 0], sizes = [64, 32], strides = [1, 1]} : vector<96x32xf32> to vector<64x32xf32>
    %71 = vector.extract_strided_slice %67 {offsets = [0, 0], sizes = [64, 32], strides = [1, 1]} : vector<96x32xf32> to vector<64x32xf32>
    %72 = tpu.concatenate %69, %70, %71 in 1 : vector<64x32xf32>, vector<64x32xf32>, vector<64x32xf32> -> vector<64x96xf32>
    %73 = arith.truncf %72 : vector<64x96xf32> to vector<64x96xbf16>
    %c0_25 = arith.constant 0 : index
    %c0_26 = arith.constant 0 : index
    %c0_27 = arith.constant 0 : index
    %74 = vector.load %arg6[%c0_25, %c0_26, %c0_27] : memref<3x96x32xbf16, #tpu.memory_space<vmem>>, vector<1x96x32xbf16>
    %75 = vector.shape_cast %74 : vector<1x96x32xbf16> to vector<96x32xbf16>
    %cst_28 = arith.constant dense<0.000000e+00> : vector<64x32xf32>
    %76 = tpu.matmul %73, %75, %cst_28 {dimension_numbers = #tpu.dot_dimension_numbers<[1], [0], [0], [1], [0, 0, 1, 1], [], []>} : vector<64x96xbf16>, vector<96x32xbf16>, vector<64x32xf32> -> vector<64x32xf32>
    %77 = arith.addf %68, %76 : vector<64x32xf32>
    %78 = vector.extract_strided_slice %60 {offsets = [16, 0], sizes = [64, 32], strides = [1, 1]} : vector<96x32xf32> to vector<64x32xf32>
    %79 = vector.extract_strided_slice %36 {offsets = [16, 0], sizes = [64, 32], strides = [1, 1]} : vector<96x32xf32> to vector<64x32xf32>
    %80 = vector.extract_strided_slice %67 {offsets = [16, 0], sizes = [64, 32], strides = [1, 1]} : vector<96x32xf32> to vector<64x32xf32>
    %81 = tpu.concatenate %78, %79, %80 in 1 : vector<64x32xf32>, vector<64x32xf32>, vector<64x32xf32> -> vector<64x96xf32>
    %82 = arith.truncf %81 : vector<64x96xf32> to vector<64x96xbf16>
    %c1 = arith.constant 1 : index
    %c0_29 = arith.constant 0 : index
    %c0_30 = arith.constant 0 : index
    %83 = vector.load %arg6[%c1, %c0_29, %c0_30] : memref<3x96x32xbf16, #tpu.memory_space<vmem>>, vector<1x96x32xbf16>
    %84 = vector.shape_cast %83 : vector<1x96x32xbf16> to vector<96x32xbf16>
    %cst_31 = arith.constant dense<0.000000e+00> : vector<64x32xf32>
    %85 = tpu.matmul %82, %84, %cst_31 {dimension_numbers = #tpu.dot_dimension_numbers<[1], [0], [0], [1], [0, 0, 1, 1], [], []>} : vector<64x96xbf16>, vector<96x32xbf16>, vector<64x32xf32> -> vector<64x32xf32>
    %86 = arith.addf %77, %85 : vector<64x32xf32>
    %87 = vector.extract_strided_slice %60 {offsets = [32, 0], sizes = [64, 32], strides = [1, 1]} : vector<96x32xf32> to vector<64x32xf32>
    %88 = vector.extract_strided_slice %36 {offsets = [32, 0], sizes = [64, 32], strides = [1, 1]} : vector<96x32xf32> to vector<64x32xf32>
    %89 = vector.extract_strided_slice %67 {offsets = [32, 0], sizes = [64, 32], strides = [1, 1]} : vector<96x32xf32> to vector<64x32xf32>
    %90 = tpu.concatenate %87, %88, %89 in 1 : vector<64x32xf32>, vector<64x32xf32>, vector<64x32xf32> -> vector<64x96xf32>
    %91 = arith.truncf %90 : vector<64x96xf32> to vector<64x96xbf16>
    %c2 = arith.constant 2 : index
    %c0_32 = arith.constant 0 : index
    %c0_33 = arith.constant 0 : index
    %92 = vector.load %arg6[%c2, %c0_32, %c0_33] : memref<3x96x32xbf16, #tpu.memory_space<vmem>>, vector<1x96x32xbf16>
    %93 = vector.shape_cast %92 : vector<1x96x32xbf16> to vector<96x32xbf16>
    %cst_34 = arith.constant dense<0.000000e+00> : vector<64x32xf32>
    %94 = tpu.matmul %91, %93, %cst_34 {dimension_numbers = #tpu.dot_dimension_numbers<[1], [0], [0], [1], [0, 0, 1, 1], [], []>} : vector<64x96xbf16>, vector<96x32xbf16>, vector<64x32xf32> -> vector<64x32xf32>
    %95 = arith.addf %86, %94 : vector<64x32xf32>
    %c0_35 = arith.constant 0 : index
    %c0_36 = arith.constant 0 : index
    %96 = vector.load %arg7[%c0_35, %c0_36] : memref<1x32xf32, #tpu.memory_space<vmem>>, vector<1x32xf32>
    %97 = vector.broadcast %96 : vector<1x32xf32> to vector<64x32xf32>
    %98 = arith.addf %95, %97 : vector<64x32xf32>
    %99 = vector.shape_cast %98 : vector<64x32xf32> to vector<1x4x16x32xf32>
    %c0_37 = arith.constant 0 : index
    %c0_38 = arith.constant 0 : index
    %c0_39 = arith.constant 0 : index
    %c0_40 = arith.constant 0 : index
    %100 = vector.load %arg8[%c0_37, %c0_38, %c0_39, %c0_40] : memref<1x4x16x32xf32, #tpu.memory_space<vmem>>, vector<1x4x16x32xf32>
    tpu.vector_store %arg8[%c0_37, %c0_38, %c0_39, %c0_40], %99 {strides = array<i32>} : memref<1x4x16x32xf32, #tpu.memory_space<vmem>>, vector<1x4x16x32xf32>,
    %cst_41 = arith.constant dense<0.000000e+00> : vector<32xf32>
    %101 = vector.multi_reduction <add>, %98, %cst_41 [0] : vector<64x32xf32> to vector<32xf32>
    %102 = vector.shape_cast %101 : vector<32xf32> to vector<1x32xf32>
    %103 = arith.mulf %98, %98 : vector<64x32xf32>
    %cst_42 = arith.constant dense<0.000000e+00> : vector<32xf32>
    %104 = vector.multi_reduction <add>, %103, %cst_42 [0] : vector<64x32xf32> to vector<32xf32>
    %105 = vector.shape_cast %104 : vector<32xf32> to vector<1x32xf32>
    %106 = tpu.concatenate %102, %105 in 0 : vector<1x32xf32>, vector<1x32xf32> -> vector<2x32xf32>
    %107 = vector.shape_cast %106 : vector<2x32xf32> to vector<1x2x32xf32>
    %c0_i32_43 = arith.constant 0 : i32
    %108 = arith.cmpi eq, %arg1, %c0_i32_43 : i32
    %109 = arith.extui %108 : i1 to i32
    %c0_i32_44 = arith.constant 0 : i32
    %110 = arith.cmpi ne, %109, %c0_i32_44 : i32
    scf.if %110 {
      %c0_47 = arith.constant 0 : index
      %c0_48 = arith.constant 0 : index
      %c0_49 = arith.constant 0 : index
      %114 = vector.load %arg9[%c0_47, %c0_48, %c0_49] : memref<1x2x32xf32, #tpu.memory_space<vmem>>, vector<1x2x32xf32>
      tpu.vector_store %arg9[%c0_47, %c0_48, %c0_49], %107 {strides = array<i32>} : memref<1x2x32xf32, #tpu.memory_space<vmem>>, vector<1x2x32xf32>,
    } else {
    }
    %c0_i32_45 = arith.constant 0 : i32
    %111 = arith.cmpi sgt, %arg1, %c0_i32_45 : i32
    %112 = arith.extui %111 : i1 to i32
    %c0_i32_46 = arith.constant 0 : i32
    %113 = arith.cmpi ne, %112, %c0_i32_46 : i32
    scf.if %113 {
      %c0_47 = arith.constant 0 : index
      %c0_48 = arith.constant 0 : index
      %c0_49 = arith.constant 0 : index
      %114 = vector.load %arg9[%c0_47, %c0_48, %c0_49] : memref<1x2x32xf32, #tpu.memory_space<vmem>>, vector<1x2x32xf32>
      %115 = arith.addf %114, %107 : vector<1x2x32xf32>
      %c0_50 = arith.constant 0 : index
      %c0_51 = arith.constant 0 : index
      %c0_52 = arith.constant 0 : index
      %116 = vector.load %arg9[%c0_50, %c0_51, %c0_52] : memref<1x2x32xf32, #tpu.memory_space<vmem>>, vector<1x2x32xf32>
      tpu.vector_store %arg9[%c0_50, %c0_51, %c0_52], %115 {strides = array<i32>} : memref<1x2x32xf32, #tpu.memory_space<vmem>>, vector<1x2x32xf32>,
    } else {
    }
    return
  }
  func.func @transform_0(%arg0: i32, %arg1: i32) -> (i32, i32, i32, i32) {
    %c4_i32 = arith.constant 4 : i32
    %0 = arith.muli %arg1, %c4_i32 : i32
    %c1_i32 = arith.constant 1 : i32
    %1 = arith.subi %0, %c1_i32 : i32
    %c0_i32 = arith.constant 0 : i32
    %2 = arith.maxsi %1, %c0_i32 : i32
    %c0_i32_0 = arith.constant 0 : i32
    %c0_i32_1 = arith.constant 0 : i32
    %c0_i32_2 = arith.constant 0 : i32
    return %arg0, %2, %c0_i32_0, %c0_i32_1 : i32, i32, i32, i32
  }
  func.func @transform_1(%arg0: i32, %arg1: i32) -> (i32, i32, i32, i32) {
    %c0_i32 = arith.constant 0 : i32
    %c0_i32_0 = arith.constant 0 : i32
    %c0_i32_1 = arith.constant 0 : i32
    return %arg0, %arg1, %c0_i32, %c0_i32_0 : i32, i32, i32, i32
  }
  func.func @transform_2(%arg0: i32, %arg1: i32) -> (i32, i32, i32, i32) {
    %c4_i32 = arith.constant 4 : i32
    %0 = arith.muli %arg1, %c4_i32 : i32
    %c4_i32_0 = arith.constant 4 : i32
    %1 = arith.addi %0, %c4_i32_0 : i32
    %c15_i32 = arith.constant 15 : i32
    %2 = arith.minsi %1, %c15_i32 : i32
    %c0_i32 = arith.constant 0 : i32
    %c0_i32_1 = arith.constant 0 : i32
    %c0_i32_2 = arith.constant 0 : i32
    return %arg0, %2, %c0_i32, %c0_i32_1 : i32, i32, i32, i32
  }
  func.func @transform_3(%arg0: i32, %arg1: i32) -> (i32, i32, i32) {
    %c0_i32 = arith.constant 0 : i32
    %c0_i32_0 = arith.constant 0 : i32
    %c0_i32_1 = arith.constant 0 : i32
    return %arg0, %c0_i32, %c0_i32_0 : i32, i32, i32
  }
  func.func @transform_4(%arg0: i32, %arg1: i32) -> (i32, i32, i32) {
    %c0_i32 = arith.constant 0 : i32
    %c0_i32_0 = arith.constant 0 : i32
    %c0_i32_1 = arith.constant 0 : i32
    %c0_i32_2 = arith.constant 0 : i32
    return %c0_i32, %c0_i32_0, %c0_i32_1 : i32, i32, i32
  }
  func.func @transform_5(%arg0: i32, %arg1: i32) -> (i32, i32) {
    %c0_i32 = arith.constant 0 : i32
    %c0_i32_0 = arith.constant 0 : i32
    %c0_i32_1 = arith.constant 0 : i32
    return %c0_i32, %c0_i32_0 : i32, i32
  }
  func.func @transform_6(%arg0: i32, %arg1: i32) -> (i32, i32, i32, i32) {
    %c0_i32 = arith.constant 0 : i32
    %c0_i32_0 = arith.constant 0 : i32
    %c0_i32_1 = arith.constant 0 : i32
    return %arg0, %arg1, %c0_i32, %c0_i32_0 : i32, i32, i32, i32
  }
  func.func @transform_7(%arg0: i32, %arg1: i32) -> (i32, i32, i32) {
    %c0_i32 = arith.constant 0 : i32
    %c0_i32_0 = arith.constant 0 : i32
    %c0_i32_1 = arith.constant 0 : i32
    return %arg0, %c0_i32, %c0_i32_0 : i32, i32, i32
  }
}

module attributes {stable_mosaic.version = 11 : i64} {
  func.func @_fused_conv_res_kernel(%arg0: i32, %arg1: i32, %arg2: memref<1x1x16x32xf32, #tpu.memory_space<vmem>>, %arg3: memref<1x4x16x32xf32, #tpu.memory_space<vmem>>, %arg4: memref<1x1x16x32xf32, #tpu.memory_space<vmem>>, %arg5: memref<1x2x32xf32, #tpu.memory_space<vmem>>, %arg6: memref<3x96x32xbf16, #tpu.memory_space<vmem>>, %arg7: memref<1x32xf32, #tpu.memory_space<vmem>>, %arg8: memref<1x4x16x32xf32, #tpu.memory_space<vmem>>, %arg9: memref<1x4x16x32xf32, #tpu.memory_space<vmem>>) attributes {dimension_semantics = [#tpu.dimension_semantics<parallel>, #tpu.dimension_semantics<parallel>], iteration_bounds = array<i64: 2, 4>, scalar_prefetch = 0 : i64, scratch_operands = 0 : i64, tpu.core_type = #tpu.core_type<tc>, window_params = [{transform_indices = @transform_0, window_bounds = array<i64: 1, 1, 16, 32>}, {transform_indices = @transform_1, window_bounds = array<i64: 1, 4, 16, 32>}, {transform_indices = @transform_2, window_bounds = array<i64: 1, 1, 16, 32>}, {transform_indices = @transform_3, window_bounds = array<i64: 1, 2, 32>}, {pipeline_mode = #tpu.pipeline_mode<synchronous>, transform_indices = @transform_4, window_bounds = array<i64: 3, 96, 32>}, {pipeline_mode = #tpu.pipeline_mode<synchronous>, transform_indices = @transform_5, window_bounds = array<i64: 1, 32>}, {transform_indices = @transform_6, window_bounds = array<i64: 1, 4, 16, 32>}, {transform_indices = @transform_7, window_bounds = array<i64: 1, 4, 16, 32>}]} {
    %c0 = arith.constant 0 : index
    %c0_0 = arith.constant 0 : index
    %c0_1 = arith.constant 0 : index
    %c0_2 = arith.constant 0 : index
    %0 = vector.load %arg2[%c0, %c0_0, %c0_1, %c0_2] : memref<1x1x16x32xf32, #tpu.memory_space<vmem>>, vector<1x1x16x32xf32>
    %1 = vector.shape_cast %0 : vector<1x1x16x32xf32> to vector<16x32xf32>
    %c0_3 = arith.constant 0 : index
    %c0_4 = arith.constant 0 : index
    %c0_5 = arith.constant 0 : index
    %c0_6 = arith.constant 0 : index
    %2 = vector.load %arg3[%c0_3, %c0_4, %c0_5, %c0_6] : memref<1x4x16x32xf32, #tpu.memory_space<vmem>>, vector<1x4x16x32xf32>
    %3 = vector.shape_cast %2 : vector<1x4x16x32xf32> to vector<64x32xf32>
    %c0_7 = arith.constant 0 : index
    %c0_8 = arith.constant 0 : index
    %c0_9 = arith.constant 0 : index
    %c0_10 = arith.constant 0 : index
    %4 = vector.load %arg4[%c0_7, %c0_8, %c0_9, %c0_10] : memref<1x1x16x32xf32, #tpu.memory_space<vmem>>, vector<1x1x16x32xf32>
    %5 = vector.shape_cast %4 : vector<1x1x16x32xf32> to vector<16x32xf32>
    %6 = tpu.concatenate %1, %3, %5 in 0 : vector<16x32xf32>, vector<64x32xf32>, vector<16x32xf32> -> vector<96x32xf32>
    %c0_11 = arith.constant 0 : index
    %c0_12 = arith.constant 0 : index
    %c0_13 = arith.constant 0 : index
    %7 = vector.load %arg5[%c0_11, %c0_12, %c0_13] : memref<1x2x32xf32, #tpu.memory_space<vmem>>, vector<1x2x32xf32>
    %8 = vector.shape_cast %7 : vector<1x2x32xf32> to vector<2x32xf32>
    %9 = vector.extract_strided_slice %8 {offsets = [0, 0], sizes = [1, 32], strides = [1, 1]} : vector<2x32xf32> to vector<1x32xf32>
    %10 = vector.broadcast %9 : vector<1x32xf32> to vector<96x32xf32>
    %11 = arith.mulf %6, %10 : vector<96x32xf32>
    %12 = vector.extract_strided_slice %8 {offsets = [1, 0], sizes = [1, 32], strides = [1, 1]} : vector<2x32xf32> to vector<1x32xf32>
    %13 = vector.broadcast %12 : vector<1x32xf32> to vector<96x32xf32>
    %14 = arith.addf %11, %13 : vector<96x32xf32>
    %15 = arith.negf %14 : vector<96x32xf32>
    %16 = math.exp %15 : vector<96x32xf32>
    %cst = arith.constant 1.000000e+00 : f32
    %17 = vector.broadcast %cst : f32 to vector<96x32xf32>
    %18 = arith.addf %17, %16 : vector<96x32xf32>
    %19 = arith.divf %17, %18 : vector<96x32xf32>
    %20 = arith.mulf %14, %19 : vector<96x32xf32>
    %21 = tpu.iota {dimensions = array<i32: 0>} : vector<96x1xi32>
    %c16_i32 = arith.constant 16 : i32
    %22 = vector.broadcast %c16_i32 : i32 to vector<96x1xi32>
    %23 = arith.cmpi slt, %21, %22 : vector<96x1xi32>
    %c0_i32 = arith.constant 0 : i32
    %24 = arith.cmpi eq, %arg1, %c0_i32 : i32
    %25 = vector.broadcast %24 : i1 to vector<96x1xi1>
    %26 = arith.andi %23, %25 : vector<96x1xi1>
    %c80_i32 = arith.constant 80 : i32
    %27 = vector.broadcast %c80_i32 : i32 to vector<96x1xi32>
    %28 = arith.cmpi sge, %21, %27 : vector<96x1xi32>
    %c3_i32 = arith.constant 3 : i32
    %29 = arith.cmpi eq, %arg1, %c3_i32 : i32
    %30 = vector.broadcast %29 : i1 to vector<96x1xi1>
    %31 = arith.andi %28, %30 : vector<96x1xi1>
    %32 = arith.ori %26, %31 : vector<96x1xi1>
    %cst_14 = arith.constant 0.000000e+00 : f32
    %33 = vector.shape_cast %32 : vector<96x1xi1> to vector<96x1xi1>
    %34 = vector.broadcast %33 : vector<96x1xi1> to vector<96x32xi1>
    %35 = vector.broadcast %cst_14 : f32 to vector<96x32xf32>
    %36 = arith.select %34, %35, %20 : vector<96x32xi1>, vector<96x32xf32>
    %37 = tpu.iota {dimensions = array<i32: 0>} : vector<96x1xi32>
    %c16_i32_15 = arith.constant 16 : i32
    %c0_i32_16 = arith.constant 0 : i32
    %38 = arith.cmpi eq, %c16_i32_15, %c0_i32_16 : i32
    %c1_i32 = arith.constant 1 : i32
    %39 = arith.select %38, %c1_i32, %c16_i32_15 : i32
    %40 = vector.broadcast %39 : i32 to vector<96x1xi32>
    %41 = arith.remsi %37, %40 : vector<96x1xi32>
    %c0_i32_17 = arith.constant 0 : i32
    %42 = vector.broadcast %c0_i32_17 : i32 to vector<96x1xi32>
    %43 = arith.cmpi ne, %41, %42 : vector<96x1xi32>
    %c0_i32_18 = arith.constant 0 : i32
    %44 = vector.broadcast %c0_i32_18 : i32 to vector<96x1xi32>
    %45 = arith.cmpi slt, %41, %44 : vector<96x1xi32>
    %c0_i32_19 = arith.constant 0 : i32
    %46 = arith.cmpi slt, %39, %c0_i32_19 : i32
    %47 = vector.broadcast %46 : i1 to vector<96x1xi1>
    %48 = vector.broadcast %47 : vector<96x1xi1> to vector<96x1xi1>
    %49 = arith.xori %45, %48 : vector<96x1xi1>
    %50 = arith.andi %49, %43 : vector<96x1xi1>
    %51 = vector.broadcast %39 : i32 to vector<96x1xi32>
    %52 = arith.addi %41, %51 : vector<96x1xi32>
    %53 = arith.select %50, %52, %41 : vector<96x1xi1>, vector<96x1xi32>
    %c0_i32_20 = arith.constant 0 : i32
    %54 = vector.broadcast %c0_i32_20 : i32 to vector<96x1xi32>
    %55 = arith.cmpi eq, %53, %54 : vector<96x1xi32>
    %c1_i32_21 = arith.constant 1 : i32
    %56 = tpu.dynamic_rotate %36 by %c1_i32_21 dim 0 : vector<96x32xf32>, i32 -> vector<96x32xf32>
    %cst_22 = arith.constant 0.000000e+00 : f32
    %57 = vector.shape_cast %55 : vector<96x1xi1> to vector<96x1xi1>
    %58 = vector.broadcast %57 : vector<96x1xi1> to vector<96x32xi1>
    %59 = vector.broadcast %cst_22 : f32 to vector<96x32xf32>
    %60 = arith.select %58, %59, %56 : vector<96x32xi1>, vector<96x32xf32>
    %c15_i32 = arith.constant 15 : i32
    %61 = vector.broadcast %c15_i32 : i32 to vector<96x1xi32>
    %62 = arith.cmpi eq, %53, %61 : vector<96x1xi32>
    %c95_i32 = arith.constant 95 : i32
    %63 = tpu.dynamic_rotate %36 by %c95_i32 dim 0 : vector<96x32xf32>, i32 -> vector<96x32xf32>
    %cst_23 = arith.constant 0.000000e+00 : f32
    %64 = vector.shape_cast %62 : vector<96x1xi1> to vector<96x1xi1>
    %65 = vector.broadcast %64 : vector<96x1xi1> to vector<96x32xi1>
    %66 = vector.broadcast %cst_23 : f32 to vector<96x32xf32>
    %67 = arith.select %65, %66, %63 : vector<96x32xi1>, vector<96x32xf32>
    %cst_24 = arith.constant 0.000000e+00 : f32
    %68 = vector.broadcast %cst_24 : f32 to vector<64x32xf32>
    %69 = vector.extract_strided_slice %60 {offsets = [0, 0], sizes = [64, 32], strides = [1, 1]} : vector<96x32xf32> to vector<64x32xf32>
    %70 = vector.extract_strided_slice %36 {offsets = [0, 0], sizes = [64, 32], strides = [1, 1]} : vector<96x32xf32> to vector<64x32xf32>
    %71 = vector.extract_strided_slice %67 {offsets = [0, 0], sizes = [64, 32], strides = [1, 1]} : vector<96x32xf32> to vector<64x32xf32>
    %72 = tpu.concatenate %69, %70, %71 in 1 : vector<64x32xf32>, vector<64x32xf32>, vector<64x32xf32> -> vector<64x96xf32>
    %73 = arith.truncf %72 : vector<64x96xf32> to vector<64x96xbf16>
    %c0_25 = arith.constant 0 : index
    %c0_26 = arith.constant 0 : index
    %c0_27 = arith.constant 0 : index
    %74 = vector.load %arg6[%c0_25, %c0_26, %c0_27] : memref<3x96x32xbf16, #tpu.memory_space<vmem>>, vector<1x96x32xbf16>
    %75 = vector.shape_cast %74 : vector<1x96x32xbf16> to vector<96x32xbf16>
    %cst_28 = arith.constant dense<0.000000e+00> : vector<64x32xf32>
    %76 = tpu.matmul %73, %75, %cst_28 {dimension_numbers = #tpu.dot_dimension_numbers<[1], [0], [0], [1], [0, 0, 1, 1], [], []>} : vector<64x96xbf16>, vector<96x32xbf16>, vector<64x32xf32> -> vector<64x32xf32>
    %77 = arith.addf %68, %76 : vector<64x32xf32>
    %78 = vector.extract_strided_slice %60 {offsets = [16, 0], sizes = [64, 32], strides = [1, 1]} : vector<96x32xf32> to vector<64x32xf32>
    %79 = vector.extract_strided_slice %36 {offsets = [16, 0], sizes = [64, 32], strides = [1, 1]} : vector<96x32xf32> to vector<64x32xf32>
    %80 = vector.extract_strided_slice %67 {offsets = [16, 0], sizes = [64, 32], strides = [1, 1]} : vector<96x32xf32> to vector<64x32xf32>
    %81 = tpu.concatenate %78, %79, %80 in 1 : vector<64x32xf32>, vector<64x32xf32>, vector<64x32xf32> -> vector<64x96xf32>
    %82 = arith.truncf %81 : vector<64x96xf32> to vector<64x96xbf16>
    %c1 = arith.constant 1 : index
    %c0_29 = arith.constant 0 : index
    %c0_30 = arith.constant 0 : index
    %83 = vector.load %arg6[%c1, %c0_29, %c0_30] : memref<3x96x32xbf16, #tpu.memory_space<vmem>>, vector<1x96x32xbf16>
    %84 = vector.shape_cast %83 : vector<1x96x32xbf16> to vector<96x32xbf16>
    %cst_31 = arith.constant dense<0.000000e+00> : vector<64x32xf32>
    %85 = tpu.matmul %82, %84, %cst_31 {dimension_numbers = #tpu.dot_dimension_numbers<[1], [0], [0], [1], [0, 0, 1, 1], [], []>} : vector<64x96xbf16>, vector<96x32xbf16>, vector<64x32xf32> -> vector<64x32xf32>
    %86 = arith.addf %77, %85 : vector<64x32xf32>
    %87 = vector.extract_strided_slice %60 {offsets = [32, 0], sizes = [64, 32], strides = [1, 1]} : vector<96x32xf32> to vector<64x32xf32>
    %88 = vector.extract_strided_slice %36 {offsets = [32, 0], sizes = [64, 32], strides = [1, 1]} : vector<96x32xf32> to vector<64x32xf32>
    %89 = vector.extract_strided_slice %67 {offsets = [32, 0], sizes = [64, 32], strides = [1, 1]} : vector<96x32xf32> to vector<64x32xf32>
    %90 = tpu.concatenate %87, %88, %89 in 1 : vector<64x32xf32>, vector<64x32xf32>, vector<64x32xf32> -> vector<64x96xf32>
    %91 = arith.truncf %90 : vector<64x96xf32> to vector<64x96xbf16>
    %c2 = arith.constant 2 : index
    %c0_32 = arith.constant 0 : index
    %c0_33 = arith.constant 0 : index
    %92 = vector.load %arg6[%c2, %c0_32, %c0_33] : memref<3x96x32xbf16, #tpu.memory_space<vmem>>, vector<1x96x32xbf16>
    %93 = vector.shape_cast %92 : vector<1x96x32xbf16> to vector<96x32xbf16>
    %cst_34 = arith.constant dense<0.000000e+00> : vector<64x32xf32>
    %94 = tpu.matmul %91, %93, %cst_34 {dimension_numbers = #tpu.dot_dimension_numbers<[1], [0], [0], [1], [0, 0, 1, 1], [], []>} : vector<64x96xbf16>, vector<96x32xbf16>, vector<64x32xf32> -> vector<64x32xf32>
    %95 = arith.addf %86, %94 : vector<64x32xf32>
    %c0_35 = arith.constant 0 : index
    %c0_36 = arith.constant 0 : index
    %96 = vector.load %arg7[%c0_35, %c0_36] : memref<1x32xf32, #tpu.memory_space<vmem>>, vector<1x32xf32>
    %97 = vector.broadcast %96 : vector<1x32xf32> to vector<64x32xf32>
    %98 = arith.addf %95, %97 : vector<64x32xf32>
    %c0_37 = arith.constant 0 : index
    %c0_38 = arith.constant 0 : index
    %c0_39 = arith.constant 0 : index
    %c0_40 = arith.constant 0 : index
    %99 = vector.load %arg8[%c0_37, %c0_38, %c0_39, %c0_40] : memref<1x4x16x32xf32, #tpu.memory_space<vmem>>, vector<1x4x16x32xf32>
    %100 = vector.shape_cast %99 : vector<1x4x16x32xf32> to vector<64x32xf32>
    %101 = arith.addf %98, %100 : vector<64x32xf32>
    %102 = vector.shape_cast %101 : vector<64x32xf32> to vector<1x4x16x32xf32>
    %c0_41 = arith.constant 0 : index
    %c0_42 = arith.constant 0 : index
    %c0_43 = arith.constant 0 : index
    %c0_44 = arith.constant 0 : index
    %103 = vector.load %arg9[%c0_41, %c0_42, %c0_43, %c0_44] : memref<1x4x16x32xf32, #tpu.memory_space<vmem>>, vector<1x4x16x32xf32>
    tpu.vector_store %arg9[%c0_41, %c0_42, %c0_43, %c0_44], %102 {strides = array<i32>} : memref<1x4x16x32xf32, #tpu.memory_space<vmem>>, vector<1x4x16x32xf32>,
    return
  }
  func.func @transform_0(%arg0: i32, %arg1: i32) -> (i32, i32, i32, i32) {
    %c4_i32 = arith.constant 4 : i32
    %0 = arith.muli %arg1, %c4_i32 : i32
    %c1_i32 = arith.constant 1 : i32
    %1 = arith.subi %0, %c1_i32 : i32
    %c0_i32 = arith.constant 0 : i32
    %2 = arith.maxsi %1, %c0_i32 : i32
    %c0_i32_0 = arith.constant 0 : i32
    %c0_i32_1 = arith.constant 0 : i32
    %c0_i32_2 = arith.constant 0 : i32
    return %arg0, %2, %c0_i32_0, %c0_i32_1 : i32, i32, i32, i32
  }
  func.func @transform_1(%arg0: i32, %arg1: i32) -> (i32, i32, i32, i32) {
    %c0_i32 = arith.constant 0 : i32
    %c0_i32_0 = arith.constant 0 : i32
    %c0_i32_1 = arith.constant 0 : i32
    return %arg0, %arg1, %c0_i32, %c0_i32_0 : i32, i32, i32, i32
  }
  func.func @transform_2(%arg0: i32, %arg1: i32) -> (i32, i32, i32, i32) {
    %c4_i32 = arith.constant 4 : i32
    %0 = arith.muli %arg1, %c4_i32 : i32
    %c4_i32_0 = arith.constant 4 : i32
    %1 = arith.addi %0, %c4_i32_0 : i32
    %c15_i32 = arith.constant 15 : i32
    %2 = arith.minsi %1, %c15_i32 : i32
    %c0_i32 = arith.constant 0 : i32
    %c0_i32_1 = arith.constant 0 : i32
    %c0_i32_2 = arith.constant 0 : i32
    return %arg0, %2, %c0_i32, %c0_i32_1 : i32, i32, i32, i32
  }
  func.func @transform_3(%arg0: i32, %arg1: i32) -> (i32, i32, i32) {
    %c0_i32 = arith.constant 0 : i32
    %c0_i32_0 = arith.constant 0 : i32
    %c0_i32_1 = arith.constant 0 : i32
    return %arg0, %c0_i32, %c0_i32_0 : i32, i32, i32
  }
  func.func @transform_4(%arg0: i32, %arg1: i32) -> (i32, i32, i32) {
    %c0_i32 = arith.constant 0 : i32
    %c0_i32_0 = arith.constant 0 : i32
    %c0_i32_1 = arith.constant 0 : i32
    %c0_i32_2 = arith.constant 0 : i32
    return %c0_i32, %c0_i32_0, %c0_i32_1 : i32, i32, i32
  }
  func.func @transform_5(%arg0: i32, %arg1: i32) -> (i32, i32) {
    %c0_i32 = arith.constant 0 : i32
    %c0_i32_0 = arith.constant 0 : i32
    %c0_i32_1 = arith.constant 0 : i32
    return %c0_i32, %c0_i32_0 : i32, i32
  }
  func.func @transform_6(%arg0: i32, %arg1: i32) -> (i32, i32, i32, i32) {
    %c0_i32 = arith.constant 0 : i32
    %c0_i32_0 = arith.constant 0 : i32
    %c0_i32_1 = arith.constant 0 : i32
    return %arg0, %arg1, %c0_i32, %c0_i32_0 : i32, i32, i32, i32
  }
  func.func @transform_7(%arg0: i32, %arg1: i32) -> (i32, i32, i32, i32) {
    %c0_i32 = arith.constant 0 : i32
    %c0_i32_0 = arith.constant 0 : i32
    %c0_i32_1 = arith.constant 0 : i32
    return %arg0, %arg1, %c0_i32, %c0_i32_0 : i32, i32, i32, i32
  }
}

</mosaic_0001>

<bundles_post_ra>
// kernel: res_block_forward.4
= control target key start
LH: loop header
LB: loop body
LE: loop exit
PB: predicated region body
PF: predicated region fallthrough
CT: control target
= control target key end

     0   :  { %6 = vsyncpa [#allocation3], 0  ;;  %s692_s0 = inlined_call_operand.hbm [shape: f32[2,16,16,32], index: 0, kind: input, shape index: {}]   ;;  %s693_s1 = inlined_call_operand.vmem [shape: f32[2,2,32], index: 1, kind: output, shape index: {}]  }
   0x1   :  { %8 = vsyncpa [#allocation3 + $0x1], 0  ;;  %s508_s6 = smov 0   ;;  %s510_s7 = smov 0  }
   0x2   :  { %s512_s8 = smov 0   ;;  %s514_s9 = smov 0  }
   0x3   :  { %s516_s10 = smov 0   ;;  %s518_s11 = smov 0  }
   0x4   :  { %s520_s12 = smov 0   ;;  %s522_s13 = smov 0  }
   0x5 LB: > { %s307_s14 = sadd.s32 4294967295, %s493_s13   ;;  %s23_s15 = sadd.s32 1, %s485_s11  ;;  %s493_s13 = sphi %s522_s13, %s14_s13   ;;  %s489_s12 = sphi %s520_s12, %s704_s12   ;;  %s485_s11 = sphi %s518_s11, %s703_s11   ;;  %s481_s10 = sphi %s516_s10, %s702_s10   ;;  %s477_s9 = sphi %s514_s9, %s701_s9   ;;  %s473_s8 = sphi %s512_s8, %s700_s8   ;;  %s469_s7 = sphi %s510_s7, %s699_s7   ;;  %s465_s6 = sphi %s508_s6, %s698_s6  }
   0x6   : > { %p24_p0 = scmp.ge.s32.totalorder %s23_s15, 4  ;;  %s26_s16 = sadd.s32 1, %s489_s12 }
   0x7   : > { %s35_s17 = sadd.s32 1, %s473_s8  ;;  %p42_p1 = scmp.ne.s32.totalorder %s473_s8, %s469_s7 }
   0x8   : > { %s706_s15 = smov (%p24_p0, %s23_s15), 0  ;;  %s708_s16 = smov (!%p24_p0, %s26_s16), %s489_s12 }
   0x9   : > { %s31_s18 = ssub.s32 %s485_s11, %s706_s15  ;;  %p43_p2 = scmp.eq.s32.totalorder %s493_s13, 0 }
   0xa   : > { %p28_p3 = scmp.ge.s32.totalorder %s708_s16, 2  ;;  %p48_p4 = scmp.ne.s32.totalorder %s469_s7, %s465_s6 }
   0xb   : > { %p559_p5 = por %p43_p2, %p42_p1  ;;  %p49_p6 = scmp.eq.s32.totalorder %s307_s14, 0 }
   0xc   : > { %s710_s16 = smov (%p28_p3, %s708_s16), 0  ;;  %p330_p8 = scmp.lt.s32.totalorder %s493_s13, 8 }
   0xd   : > { %p565_p7 = por %p49_p6, %p48_p4  ;;  %s30_s21 = ssub.s32 %s489_s12, %s710_s16 }
   0xe   : > { %s32_s22 = sor.u32 %s31_s18, %s30_s21  ;;  %s98_s23 = sand.u32 1, %s473_s8  }
   0xf   : > { %p33_p9 = scmp.eq.s32.totalorder %s32_s22, 0  ;;  %s311_s24 = sshll.u32 %s98_s23, 6 }
  0x10   : > { %s323_s25 = sshll.u32 %s485_s11, 3  ;;  %s314_s27 = sshll.u32 %s489_s12, 5 }
  0x11   : > { %s575_s26 = scalar_select %p33_p9, %s473_s8, %s35_s17  }
  0x12   : > { %s109_s28 = sadd.s32 %s323_s25, %s314_s27  ;;  %s102_s29 = scalar_lea.vmem [#allocation2], %s311_s24 }
  0x13   : > { %s112_s30 = sshll.u32 %s102_s29, 4  ;;  %s315_s2 = sshll.u32 %s109_s28, 7  ;;  %s578_s30 = int_to_ptr.vmem [resolvable:$true] %s112_s30 }
  0x14   : > { %s583_s5 = scalar_lea.hbm %s692_s0, %s315_s2  ;;  %p589_p10 = pnand %p330_p8, %p559_p5 }
  0x15   : > { %s594_s14 = scalar_lea.sflag [#allocation3], %s98_s23  ;;  %s397_s17 = scalar_lea.hbm %s583_s5, 1024 }
  0x16   : > { %p398_p12 = scmp.ne.s32.totalorder %s583_s5, %s397_s17  ;;  %p399_p13 = pneg %p589_p10 }
  0x17   : > { %s402_s21 = scalar_lea.hbm %s692_s0, 8192  ;;  %p403_p2 = scmp.lt.u32.totalorder %s583_s5, %s692_s0 }
  0x18   : > { %p400_p0 = pnand %p399_p13, %p398_p12  ;;  %p404_p3 = scmp.lt.u32.totalorder %s402_s21, %s397_s17 }
  0x19   : > { %p406_p5 = scmp.lt.u32.totalorder %s397_s17, %s583_s5 }
  0x1a   : > { %p401_p1 = pneg %p400_p0  ;;  %p405_p4 = por %p404_p3, %p403_p2 }
  0x1c   : > { %p407_p6 = por %p406_p5, %p405_p4 }
  0x1e   : > { %p408_p8 = pnand %p407_p6, %p401_p1 }
  0x20   : > { %411 = shalt.err (!%p408_p8)
}
  0x21   : > { %s412_s23 = scalar_lea.vmem %s578_s30, 1024  ;;  %s495_s25 = smov [#allocation2]  }
  0x22   : > { %p413_p9 = scmp.ne.s32.totalorder %s578_s30, %s412_s23  ;;  %s417_s27 = sshll.u32 %s495_s25, 4  ;;  %s418_s27 = int_to_ptr.vmem [resolvable:$false] %s417_s27 }
  0x23   : > { %s419_s28 = scalar_lea.vmem %s418_s27, 2048  ;;  %p420_p11 = scmp.lt.s32.totalorder %s578_s30, %s418_s27 }
  0x24   : > { %p415_p12 = pnand %p413_p9, %p399_p13  ;;  %p421_p2 = scmp.lt.s32.totalorder %s419_s28, %s412_s23 }
  0x26   : > { %p416_p0 = pneg %p415_p12  ;;  %p422_p3 = por %p421_p2, %p420_p11 }
  0x28   : > { %p423_p4 = pnand %p422_p3, %p416_p0 }
  0x2a   : > { %426 = shalt.err (!%p423_p4)
}
  0x2b   : > { %s496_s29 = smov 128   ;;  %s497_s2 = smov 8  }
  0x2c   : > { %329 = dma.hbm_to_vmem [thread:$0]  (!%p589_p10), %s583_s5, 1024, %s578_s30, %s594_s14, %s496_s29, %s496_s29, %s497_s2  }
  0x2d   : > { %p120_p13 = scmp.lt.s32.totalorder %s493_s13, 9  ;;  %p697_p1 = scmp.ge.s32.totalorder %s493_s13, 1 }
  0x2f   : > { %p121_p5 = pnand %p697_p1, %p120_p13 }
  0x30   : > { %s126_s3 = sand.u32 (!%p121_p5), 1, %s469_s7  }
  0x31   : > { %124 = sbr.rel (%p121_p5) target bundleno = 100 (0x64), region = 24  ;;  %s317_s4 = sshll.u32 (!%p121_p5), %s126_s3, 6 }
  0x32   : > { %s127_s17 = scalar_lea.sflag (!%p121_p5), [#allocation3], %s126_s3  ;;  %s626_s18 = scalar_lea.vmem (!%p121_p5), [#allocation2], %s317_s4 }
  0x38   : > { %460 = dma.done.wait (%p565_p7), %s127_s17, 1024  }
  0x39   : > { %462 = vsyncadd (%p565_p7), %s127_s17, 4294966272  ;;  %p149_p10 = scmp.lt.s32.totalorder %s481_s10, 1  ;;  %vm161_vm0 = vcmask 261120   ;;  %v153_v0 = vld [vmem:[%s626_s18] sm:$0xff]  ;;  %v154_v1 = vld [vmem:[%s626_s18 + $0x8] sm:$0xff]  ;;  %vm212_vm1 = vcmask 1040384  }
  0x3a   : > { %v155_v2 = vld [vmem:[%s626_s18 + $0x10] sm:$0xff]  ;;  %v156_v3 = vld [vmem:[%s626_s18 + $0x18] sm:$0xff]  ;;  %v162_v4 = vsel %vm161_vm0, %v153_v0, 0.0  ;;  %v163_v5 = vsel %vm161_vm0, %v154_v1, 0.0  ;;  %v183_v7 = vmul.f32 %v153_v0, %v153_v0  ;;  %v157_v8 = vld [vmem:[%s626_s18 + $0x20] sm:$0xff]  ;;  %v184_v11 = vmul.f32 %v154_v1, %v154_v1  ;;  %p319_p7 = scmp.ne.s32.totalorder %s477_s9, 0 }
  0x3b   : > { %s712_s10 = smov (!%p149_p10, %s481_s10), 1  ;;  %v165_v6 = vsel %vm161_vm0, %v155_v2, 0.0  ;;  %v164_v9 = vadd.f32 %v163_v5, %v162_v4  ;;  %v167_v10 = vsel %vm161_vm0, %v156_v3, 0.0  ;;  %v185_v12 = vmul.f32 %v155_v2, %v155_v2  ;;  %v158_v13 = vld [vmem:[%s626_s18 + $0x28] sm:$0xff]  ;;  %v159_v20 = vld [vmem:[%s626_s18 + $0x30] sm:$0xff]  ;;  %v160_v27 = vld [vmem:[%s626_s18 + $0x38] sm:$0xff] }
  0x3c   : > { %s318_s30 = sshll.u32 %s712_s10, 1  ;;  %v186_v15 = vmul.f32 %v156_v3, %v156_v3  ;;  %v169_v16 = vsel %vm161_vm0, %v157_v8, 0.0  ;;  %v187_v17 = vmul.f32 %v157_v8, %v157_v8  ;;  %v191_v18 = vsel %vm161_vm0, %v183_v7, 0.0 }
  0x3d   : > { %s637_s14 = scalar_lea.vmem %s693_s1, %s318_s30  ;;  %v166_v14 = vadd.f32 %v165_v6, %v164_v9  ;;  %v192_v19 = vsel %vm161_vm0, %v184_v11, 0.0  ;;  %v194_v23 = vsel %vm161_vm0, %v185_v12, 0.0  ;;  %v171_v24 = vsel %vm161_vm0, %v158_v13, 0.0 }
  0x3e   : > { %v193_v22 = vadd.f32 %v192_v19, %v191_v18  ;;  %v188_v25 = vmul.f32 %v158_v13, %v158_v13  ;;  %v196_v26 = vsel %vm161_vm0, %v186_v15, 0.0  ;;  %v173_v30 = vsel %vm161_vm0, %v159_v20, 0.0 }
  0x3f   : > { %v168_v21 = vadd.f32 %v167_v10, %v166_v14  ;;  %v189_v31 = vmul.f32 %v159_v20, %v159_v20  ;;  %v198_v32 = vsel %vm161_vm0, %v187_v17, 0.0  ;;  %v175_v35 = vsel %vm161_vm0, %v160_v27, 0.0 }
  0x40   : > { %v195_v29 = vadd.f32 %v194_v23, %v193_v22  ;;  %v190_v36 = vmul.f32 %v160_v27, %v160_v27  ;;  %v200_v37 = vsel %vm161_vm0, %v188_v25, 0.0  ;;  %vm218_vm2 = vcmask (!%p319_p7), 254976  }
  0x41   : > { %v170_v28 = vadd.f32 %v169_v16, %v168_v21  ;;  %v202_v40 = vsel %vm161_vm0, %v189_v31, 0.0 }
  0x42   : > { %v197_v34 = vadd.f32 %v196_v26, %v195_v29  ;;  %v204_v43 = vsel %vm161_vm0, %v190_v36, 0.0 }
  0x43   : > { %v172_v33 = vadd.f32 %v171_v24, %v170_v28 }
  0x44   : > { %v199_v39 = vadd.f32 %v198_v32, %v197_v34 }
  0x45   : > { %v174_v38 = vadd.f32 %v173_v30, %v172_v33 }
  0x46   : > { %v201_v42 = vadd.f32 %v200_v37, %v199_v39 }
  0x47   : > { %v176_v41 = vadd.f32 %v175_v35, %v174_v38 }
  0x48   : > { %v203_v45 = vadd.f32 %v202_v40, %v201_v42 }
  0x49   : > { %v177_v44 = vrot.slane %v176_v41, 4 }
  0x4a   : > { %v205_v47 = vadd.f32 %v204_v43, %v203_v45 }
  0x4b   : > { %v178_v46 = vadd.f32 %v177_v44, %v176_v41 }
  0x4c   : > { %v206_v49 = vrot.slane %v205_v47, 4 }
  0x4d   : > { %v179_v48 = vrot.slane %v178_v46, 2 }
  0x4e   : > { %v207_v51 = vadd.f32 %v206_v49, %v205_v47 }
  0x4f   : > { %v180_v50 = vadd.f32 %v179_v48, %v178_v46 }
  0x50   : > { %v208_v53 = vrot.slane %v207_v51, 2 }
  0x51   : > { %v181_v52 = vrot.slane %v180_v50, 1 }
  0x52   : > { %v209_v54 = vadd.f32 %v208_v53, %v207_v51  ;;  %217 = sbr.rel (%p319_p7) target bundleno = 90 (0x5a), region = 32 }
  0x53   : > { %v182_v55 = vadd.f32 %v181_v52, %v180_v50 }
  0x54   : > { %v210_v56 = vrot.slane %v209_v54, 1 }
  0x56   : > { %v211_v57 = vadd.f32 %v210_v56, %v209_v54 }
  0x58   : > { %v213_v58 = vsel %vm212_vm1, %v182_v55, %v211_v57 }
  0x59   : > { %219 = vst.msk [vmem:[%s637_s14] sm:$0x3] %vm218_vm2, %v213_v58 }
  0x5a PF: > { %p320_p11 = scmp.le.s32.totalorder %s477_s9, 0 }
  0x5b   : > { %vm226_vm3 = vcmask (!%p320_p11), 254976  }
  0x5c   : > { %223 = sbr.rel (%p320_p11) target bundleno = 100 (0x64), region = 36 }
  0x60   : > { %v224_v59 = vld [vmem:[%s637_s14] sm:$0x3] (!%p320_p11) }
  0x61   : > { %v225_v60 = vadd.f32 (!%p320_p11), %v224_v59, %v213_v58 }
  0x63   : > { %227 = vst.msk [vmem:[%s637_s14] sm:$0x3] %vm226_vm3, %v225_v60 }
  0x64 PF: > { %s14_s13 = sadd.s32 1, %s493_s13   ;;  %s698_s6 = smov %s469_s7 }
  0x65   : > { %p11_p6 = scmp.ge.s32.totalorder %s14_s13, 10   ;;  %s699_s7 = smov %s473_s8 }
  0x66   : > { %s700_s8 = smov %s575_s26  ;;  %s701_s9 = smov %s485_s11 }
  0x67   : > { %s702_s10 = smov %s489_s12  ;;  %s703_s11 = smov %s706_s15 }
  0x68   : > { %s704_s12 = smov %s710_s16  ;;  %13 = sbr.rel (!%p11_p6) target bundleno = 5 (0x5), region = 72 }
  0x6f   :  { %247 = vsyncpa [#allocation3], 1 }
  0x70   :  { %249 = vsyncpa [#allocation3 + $0x1], 1 }

// kernel: res_block_forward.5
= control target key start
LH: loop header
LB: loop body
LE: loop exit
PB: predicated region body
PF: predicated region fallthrough
CT: control target
= control target key end

     0   :  { %v194_v0 = vmov 0.0   ;;  %vm195_vm0 = vmmov 0   ;;  %vm135_vm1 = vcmask 254976   ;;  %s249_s1 = inlined_call_operand.vmem [shape: bf16[128,32], index: 1, kind: input, shape index: {}]   ;;  %s250_s0 = inlined_call_operand.vmem [shape: f32[2,128], index: 0, kind: input, shape index: {}]   ;;  %s251_s2 = inlined_call_operand.vmem [shape: f32[1,32], index: 2, kind: input, shape index: {}]   ;;  %s252_s3 = inlined_call_operand.vmem [shape: f32[2,32], index: 3, kind: output, shape index: {}]  }
   0x1   :  { %160 = vmatprep.subr.bf16.mxu0 %v194_v0  ;;  %v182_v1 = vld [vmem:[%s249_s1] sm:$0xff]   ;;  %176 = vmatprep.mubr.msk.bf16.mxu0 %vm195_vm0, %v194_v0  ;;  %v183_v2 = vld [vmem:[%s249_s1 + $0x8] sm:$0xff]   ;;  %v184_v3 = vld [vmem:[%s249_s1 + $0x10] sm:$0xff]  }
   0x2   :  { %161 = vmatpush3.bf16.msra.mxu0 %v182_v1  ;;  %v15_v4 = vld [vmem:[%s250_s0] sm:$0x3]  ;;  %v185_v6 = vld [vmem:[%s249_s1 + $0x18] sm:$0xff]   ;;  %v187_v8 = vld [vmem:[%s249_s1 + $0x28] sm:$0xff]  }
   0x3   :  { %162 = vmatprep.subr.bf16.mxu0 %v194_v0  ;;  %v141_v5 = vmul.f32 -1.442695, %v15_v4  ;;  %v186_v7 = vld [vmem:[%s249_s1 + $0x20] sm:$0xff]   ;;  %v188_v10 = vld [vmem:[%s249_s1 + $0x30] sm:$0xff]   ;;  %v189_v12 = vld [vmem:[%s249_s1 + $0x38] sm:$0xff]  }
   0x4   :  { %v142_v16 = vld [vmem:[%s251_s2] ss:$0 sm:$0xff] }
   0x5   :  { %190 = vpow2.f32 %v141_v5 }
   0x6   :  { %163 = vmatpush3.bf16.msra.mxu0 %v183_v2 }
   0x7   :  { %164 = vmatprep.subr.bf16.mxu0 %v194_v0 }
   0xa   :  { %165 = vmatpush3.bf16.msra.mxu0 %v184_v3 }
   0xb   :  { %166 = vmatprep.subr.bf16.mxu0 %v194_v0 }
   0xe   :  { %167 = vmatpush3.bf16.msra.mxu0 %v185_v6 }
   0xf   :  { %168 = vmatprep.subr.bf16.mxu0 %v194_v0  ;;  %v191_v9 = vpop.eup %190 }
  0x10   :  { %v19_v11 = vadd.f32 1.0, %v191_v9 }
  0x12   :  { %169 = vmatpush3.bf16.msra.mxu0 %v186_v7  ;;  %192 = vrcp.f32 %v19_v11 }
  0x13   :  { %170 = vmatprep.subr.bf16.mxu0 %v194_v0 }
  0x16   :  { %171 = vmatpush3.bf16.msra.mxu0 %v187_v8 }
  0x17   :  { %172 = vmatprep.subr.bf16.mxu0 %v194_v0 }
  0x1a   :  { %173 = vmatpush3.bf16.msra.mxu0 %v188_v10 }
  0x1b   :  { %174 = vmatprep.subr.bf16.mxu0 %v194_v0 }
  0x1c   :  { %v193_v13 = vpop.eup %192 }
  0x1d   :  { %v22_v14 = vmul.f32 %v193_v13, %v15_v4 }
  0x1e   :  { %175 = vmatpush3.bf16.msra.mxu0 %v189_v12 }
  0x1f   :  { %v23_v15 = vpack.c.bf16 %v22_v14, %v22_v14 }
  0x21   :  { %177 = vmatmul.mubr.bf16.vlgmr.msra.gmra.mrb[0].mxu0 %v23_v15 }
  0xf4   :  { %v129_v17 = vpop.f32.mrb[0].mxu0 }
  0xf5   :  { %v130_v18 = vadd.f32 %v142_v16, %v129_v17  ;;  %v178_v19 = vpop.f32.mrb[1].mxu0 }
  0xf6   :  { %v132_v20 = vpop.f32.mrb[2].mxu0 }
  0xf7   :  { %136 = vst.msk [vmem:[%s252_s3] sm:$0x3] %vm135_vm1, %v130_v18  ;;  %v179_v21 = vpop.f32.mrb[3].mxu0 }

// kernel: res_block_forward.6
= control target key start
LH: loop header
LB: loop body
LE: loop exit
PB: predicated region body
PF: predicated region fallthrough
CT: control target
= control target key end

     0   :  { %s2259_s24 = smov 0   ;;  %s2261_s25 = smov 0   ;;  %s2817_s0 = inlined_call_operand.vmem [shape: f32[2,16,16,32], index: 0, kind: input, shape index: {}, may-alias: {0,1,2}]   ;;  %s2818_s1 = inlined_call_operand.vmem [shape: f32[2,16,16,32], index: 1, kind: input, shape index: {}, may-alias: {0,1,2}]   ;;  %s2819_s2 = inlined_call_operand.vmem [shape: f32[2,16,16,32], index: 2, kind: input, shape index: {}, may-alias: {0,1,2}]   ;;  %s2820_s3 = inlined_call_operand.vmem [shape: f32[2,2,32], index: 3, kind: input, shape index: {}]   ;;  %s2821_s4 = inlined_call_operand.vmem [shape: bf16[3,96,32], index: 4, kind: input, shape index: {}]   ;;  %s2822_s5 = inlined_call_operand.vmem [shape: f32[1,32], index: 5, kind: input, shape index: {}]   ;;  %s2823_s6 = inlined_call_operand.vmem [shape: f32[2,16,16,32], index: 6, kind: output, shape index: {0}]   ;;  %s2824_s7 = inlined_call_operand.vmem [shape: f32[2,2,32], index: 7, kind: output, shape index: {1}]  }
   0x1   :  { %s2263_s26 = smov 0   ;;  %s2265_s27 = smov 0  }
   0x2   :  { %s2267_s28 = smov 0  }
   0x3 LB: > { %s27_s29 = sadd.s32 1, %s2207_s26  ;;  %s30_s30 = sadd.s32 1, %s2211_s27  ;;  %s2215_s28 = sphi %s2267_s28, %s18_s28   ;;  %s2211_s27 = sphi %s2265_s27, %s2855_s27   ;;  %s2207_s26 = sphi %s2263_s26, %s2854_s26   ;;  %s2203_s25 = sphi %s2261_s25, %s2853_s25   ;;  %s2199_s24 = sphi %s2259_s24, %s2852_s24  }
   0x4   : > { %p28_p0 = scmp.ge.s32.totalorder %s27_s29, 4  ;;  %p1790_p1 = scmp.ge.s32.totalorder %s2215_s28, 1 }
   0x5   : > { %p335_p2 = scmp.lt.s32.totalorder %s2215_s28, 9 }
   0x6   : > { %s2857_s29 = smov (%p28_p0, %s27_s29), 0  ;;  %s2859_s30 = smov (!%p28_p0, %s30_s30), %s2211_s27 }
   0x7   : > { %p336_p3 = pnand %p1790_p1, %p335_p2  ;;  %p32_p4 = scmp.ge.s32.totalorder %s2859_s30, 2 }
   0x8   : > { %s2292_s8 = sshll.u32 (!%p336_p3), %s2199_s24, 2  ;;  %p415_p5 = scmp.lt.s32.totalorder (!%p336_p3), %s2203_s25, 1  ;;  %v2111_v0 = vld [vmem:[%s2821_s4] sm:$0xff] (!%p336_p3)   ;;  %v2112_v1 = vld [vmem:[%s2821_s4 + $0x30] sm:$0xff] (!%p336_p3)   ;;  %v2113_v2 = vld [vmem:[%s2821_s4 + $0x8] sm:$0xff] (!%p336_p3)   ;;  %v489_v4 = vlaneseq (!%p336_p3)  ;;  %vm1076_vm11 = vcmask (!%p336_p3), 261120  }
   0x9   : > { %s2861_s30 = smov (%p32_p4, %s2859_s30), 0  ;;  %339 = sbr.rel (%p336_p3) target bundleno = 476 (0x1dc), region = 44 }
   0xa   : > { %s1792_s9 = sadd.s32 (!%p336_p3), 4294967295, %s2292_s8  ;;  %p431_p6 = scmp.lt.s32.totalorder (!%p336_p3), %s2292_s8, 15  ;;  %1941 = vmatprep.subr.bf16.mxu0 (!%p336_p3), %v2111_v0  ;;  %1921 = vmatprep.subr.bf16.mxu1 (!%p336_p3), %v2112_v1  ;;  %v2114_v3 = vld [vmem:[%s2821_s4 + $0x38] sm:$0xff] (!%p336_p3)   ;;  %v2115_v5 = vld [vmem:[%s2821_s4 + $0x10] sm:$0xff] (!%p336_p3)   ;;  %v2116_v6 = vld [vmem:[%s2821_s4 + $0x40] sm:$0xff] (!%p336_p3)   ;;  %v2328_v7 = vshrl.u32 (!%p336_p3), %v489_v4, 7 }
   0xb   : > { %p413_p7 = scmp.gt.s32.totalorder (!%p336_p3), %s1792_s9, 0  ;;  %p1793_p8 = scmp.lt.s32.totalorder (!%p336_p3), %s1792_s9, 15  ;;  %1942 = vmatpush3.bf16.msra.mxu0 (!%p336_p3), %v2111_v0  ;;  %1922 = vmatpush3.bf16.msra.mxu1 (!%p336_p3), %v2112_v1  ;;  %v2117_v8 = vld [vmem:[%s2821_s4 + $0x18] sm:$0xff] (!%p336_p3)   ;;  %vm1085_vm14 = vcmask (!%p336_p3), 523264   ;;  %vm1180_vm15 = vcmask (!%p336_p3), 785408  }
   0xc   : > { %s440_s20 = sadd.s32 (!%p336_p3), 4, %s2292_s8  ;;  %1943 = vmatprep.subr.bf16.mxu0 (!%p336_p3), %v2113_v2  ;;  %1923 = vmatprep.subr.bf16.mxu1 (!%p336_p3), %v2114_v3  ;;  %v491_v9 = vsub.s32 (!%p336_p3), 0, %v2328_v7  ;;  %v507_v10 = vsub.s32 (!%p336_p3), 1, %v2328_v7  ;;  %p630_p10 = scmp.eq.s32.totalorder (!%p336_p3), %s2199_s24, 0  ;;  %vm963_vm1 = vcmp.lt.s32.totalorder (!%p336_p3), %v2328_v7, 7  ;;  %vm890_vm6 = vcmp.lt.s32.totalorder (!%p336_p3), %v2328_v7, 1 }
   0xd   : > { %p2324_p9 = scmp.lt.s32.totalorder (!%p336_p3), %s440_s20, 15  ;;  %p658_p11 = scmp.eq.s32.totalorder (!%p336_p3), %s2199_s24, 3 }
   0xe   : > { %p1885_p12 = scmp.ne.s32.totalorder (!%p336_p3), %s2199_s24, 0 }
   0xf   : > { %1944 = vmatpush3.bf16.msra.mxu0 (!%p336_p3), %v2113_v2  ;;  %1924 = vmatpush3.bf16.msra.mxu1 (!%p336_p3), %v2114_v3 }
  0x10   : > { %s2863_s25 = smov (!%p415_p5, %s2203_s25), 1  ;;  %s2867_s8 = smov (!%p431_p6, %s2292_s8), 15  ;;  %1945 = vmatprep.subr.bf16.mxu0 %v2115_v5  ;;  %1925 = vmatprep.subr.bf16.mxu1 %v2116_v6 }
  0x11   : > { %s414_s18 = scalar_select %p413_p7, %s1792_s9, 0 }
  0x12   : > { %s2311_s19 = sshll.u32 %s2863_s25, 5  ;;  %s1802_s9 = sshll.u32 %s2867_s8, 1 }
  0x13   : > { %s2865_s18 = smov (!%p1793_p8, %s414_s18), 15  ;;  %s2335_s17 = sadd.s32 %s1802_s9, %s2311_s19  ;;  %1946 = vmatpush3.bf16.msra.mxu0 %v2115_v5  ;;  %1926 = vmatpush3.bf16.msra.mxu1 %v2116_v6 }
  0x14   : > { %s1798_s11 = sshll.u32 %s2865_s18, 1  ;;  %s1804_s23 = sshll.u32 %s2335_s17, 3  ;;  %1947 = vmatprep.subr.bf16.mxu0 %v2117_v8 }
  0x15   : > { %s421_s13 = sadd.s32 %s2311_s19, %s1798_s11  ;;  %s2346_s11 = scalar_lea.vmem %s2818_s1, %s1804_s23 }
  0x16   : > { %s1800_s16 = sshll.u32 %s421_s13, 3  ;;  %s1812_s13 = sshll.u32 %s2863_s25, 1  ;;  %v478_v13 = vld [vmem:[%s2346_s11] sm:$0xff]  ;;  %v479_v14 = vld [vmem:[%s2346_s11 + $0x8] sm:$0xff]  ;;  %v480_v15 = vld [vmem:[%s2346_s11 + $0x10] sm:$0xff] }
  0x17   : > { %s423_s22 = scalar_lea.vmem %s2817_s0, %s1800_s16  ;;  %s2869_s20 = smov (!%p2324_p9, %s440_s20), 15  ;;  %v481_v17 = vld [vmem:[%s2346_s11 + $0x18] sm:$0xff]  ;;  %v482_v18 = vld [vmem:[%s2346_s11 + $0x20] sm:$0xff]  ;;  %v483_v21 = vld [vmem:[%s2346_s11 + $0x28] sm:$0xff]  ;;  %1948 = vmatpush3.bf16.msra.mxu0 %v2117_v8 }
  0x18   : > { %v476_v11 = vld [vmem:[%s423_s22] sm:$0xff]  ;;  %v477_v12 = vld [vmem:[%s423_s22 + $0x8] sm:$0xff]  ;;  %s459_s15 = scalar_lea.vmem %s2820_s3, %s1812_s13  ;;  %s2871_s20 = smov (!%p2324_p9, %s2869_s20), 15  ;;  %v484_v30 = vld [vmem:[%s2346_s11 + $0x30] sm:$0xff] }
  0x19   : > { %v488_v16 = vld [vmem:[%s459_s15] sm:$0x3]  ;;  %s2366_s18 = scalar_lea.vmem %s2824_s7, %s1812_s13  ;;  %s1809_s21 = sshll.u32 %s2871_s20, 1  ;;  %v485_v40 = vld [vmem:[%s2346_s11 + $0x38] sm:$0xff] }
  0x1a   : > { %v492_v19 = vrot.slane %v488_v16, %v491_v9  ;;  %v508_v20 = vrot.slane %v488_v16, %v507_v10  ;;  %s449_s22 = sadd.s32 %s1809_s21, %s2311_s19  ;;  %v609_v16 = vadd.s32 24, %v2328_v7  ;;  %s2218_s20 = smov 64  }
  0x1b   : > { %s1811_s12 = sshll.u32 %s449_s22, 3  ;;  %s2763_s11 = scalar_lea.vmem %s2823_s6, %s1804_s23 }
  0x1c   : > { %v493_v22 = vmul.f32 %v492_v19, %v476_v11  ;;  %v494_v23 = vmul.f32 %v492_v19, %v477_v12  ;;  %v495_v24 = vmul.f32 %v492_v19, %v478_v13  ;;  %v496_v25 = vmul.f32 %v492_v19, %v479_v14  ;;  %s451_s13 = scalar_lea.vmem %s2819_s2, %s1811_s12 }
  0x1d   : > { %v497_v26 = vmul.f32 %v492_v19, %v480_v15  ;;  %v498_v27 = vmul.f32 %v492_v19, %v481_v17  ;;  %v499_v28 = vmul.f32 %v492_v19, %v482_v18  ;;  %v500_v29 = vmul.f32 %v492_v19, %v483_v21  ;;  %v486_v35 = vld [vmem:[%s451_s13] sm:$0xff]  ;;  %v487_v47 = vld [vmem:[%s451_s13 + $0x8] sm:$0xff]  ;;  %s2412_s19 = scalar_select %p630_p10, 1, 0 }
  0x1e   : > { %v2374_v31 = vadd.f32 %v508_v20, %v493_v22  ;;  %v2376_v32 = vadd.f32 %v508_v20, %v494_v23  ;;  %v2378_v33 = vadd.f32 %v508_v20, %v495_v24  ;;  %v2380_v34 = vadd.f32 %v508_v20, %v496_v25  ;;  %v2118_v21 = vld [vmem:[%s2821_s4 + $0x48] sm:$0xff]   ;;  %v2119_v22 = vld [vmem:[%s2821_s4 + $0x20] sm:$0xff]   ;;  %s2433_s15 = scalar_select %p658_p11, 1, 0 }
  0x1f   : > { %v2382_v36 = vadd.f32 %v508_v20, %v497_v26  ;;  %v2384_v37 = vadd.f32 %v508_v20, %v498_v27  ;;  %v2386_v38 = vadd.f32 %v508_v20, %v499_v28  ;;  %v2388_v39 = vadd.f32 %v508_v20, %v500_v29  ;;  %1927 = vmatprep.subr.bf16.mxu1 %v2118_v21 }
  0x20   : > { %v1818_v41 = vmul.f32 -1.442695, %v2374_v31  ;;  %v1819_v42 = vmul.f32 -1.442695, %v2376_v32  ;;  %v1820_v43 = vmul.f32 -1.442695, %v2378_v33  ;;  %v501_v44 = vmul.f32 %v492_v19, %v484_v30  ;;  %1949 = vmatprep.subr.bf16.mxu0 %v2119_v22  ;;  %1928 = vmatpush3.bf16.msra.mxu1 %v2118_v21 }
  0x21   : > { %v1821_v45 = vmul.f32 -1.442695, %v2380_v34  ;;  %v1822_v46 = vmul.f32 -1.442695, %v2382_v36  ;;  %v1823_v48 = vmul.f32 -1.442695, %v2384_v37  ;;  %v502_v52 = vmul.f32 %v492_v19, %v485_v40  ;;  %1950 = vmatpush3.bf16.msra.mxu0 %v2119_v22 }
  0x22   : > { %2129 = vpow2.f32 %v1818_v41  ;;  %v1824_v49 = vmul.f32 -1.442695, %v2386_v38  ;;  %v1825_v50 = vmul.f32 -1.442695, %v2388_v39  ;;  %v2399_v51 = vadd.f32 %v508_v20, %v501_v44 }
  0x23   : > { %2131 = vpow2.f32 %v1819_v42  ;;  %v503_v53 = vmul.f32 %v492_v19, %v486_v35  ;;  %v504_v54 = vmul.f32 %v492_v19, %v487_v47  ;;  %v2402_v56 = vadd.f32 %v508_v20, %v502_v52 }
  0x24   : > { %2133 = vpow2.f32 %v1820_v43  ;;  %v1826_v55 = vmul.f32 -1.442695, %v2399_v51  ;;  %v607_v13 = vadd.s32 8, %v2328_v7  ;;  %v611_v19 = vadd.s32 40, %v2328_v7 }
  0x25   : > { %2135 = vpow2.f32 %v1821_v45  ;;  %v2404_v57 = vadd.f32 %v508_v20, %v503_v53  ;;  %v2406_v58 = vadd.f32 %v508_v20, %v504_v54  ;;  %v1827_v59 = vmul.f32 -1.442695, %v2402_v56  ;;  %v2120_v45 = vld [vmem:[%s2821_s4 + $0x50] sm:$0xff]  }
  0x26   : > { %2137 = vpow2.f32 %v1822_v46  ;;  %v632_v24 = vstv %s2412_s19  ;;  %v2426_v25 = vadd.s32 56, %v2328_v7  ;;  %v733_v28 = vand.u32 15, %v607_v13  ;;  %v2121_v46 = vld [vmem:[%s2821_s4 + $0x28] sm:$0xff]   ;;  %1929 = vmatprep.subr.bf16.mxu1 %v2120_v45  ;;  %s2217_s19 = smov 32  }
  0x27   : > { %2139 = vpow2.f32 %v1823_v48  ;;  %v1828_v60 = vmul.f32 -1.442695, %v2404_v57  ;;  %v1829_v61 = vmul.f32 -1.442695, %v2406_v58  ;;  %v2429_v30 = vadd.s32 72, %v2328_v7  ;;  %1951 = vmatprep.subr.bf16.mxu0 %v2121_v46  ;;  %1930 = vmatpush3.bf16.msra.mxu1 %v2120_v45 }
  0x28   : > { %2141 = vpow2.f32 %v1824_v49  ;;  %v747_v35 = vand.u32 15, %v609_v16  ;;  %v2436_v41 = vadd.s32 88, %v2328_v7  ;;  %vm2438_vm0 = vcmp.eq.s32.totalorder %v632_v24, 1  ;;  %1952 = vmatpush3.bf16.msra.mxu0 %v2121_v46 }
  0x29   : > { %2143 = vpow2.f32 %v1825_v50  ;;  %v761_v44 = vand.u32 15, %v611_v19  ;;  %v775_v49 = vand.u32 15, %v2426_v25  ;;  %vm2452_vm2 = vcmp.eq.s32.totalorder %v733_v28, 15 }
  0x2a   : > { %2145 = vpow2.f32 %v1826_v55  ;;  %v660_v54 = vstv %s2433_s15  ;;  %v789_v55 = vand.u32 15, %v2429_v30  ;;  %vm2465_vm3 = vcmp.eq.s32.totalorder %v747_v35, 15 }
  0x2b   : > { %2147 = vpow2.f32 %v1827_v59  ;;  %vm2478_vm4 = vcmp.eq.s32.totalorder %v761_v44, 15  ;;  %vm2494_vm5 = vcmp.eq.s32.totalorder %v660_v54, 1  ;;  %vm2557_vm7 = vcmp.eq.s32.totalorder %v775_v49, 15 }
  0x2c   : > { %v2130_v62 = vpop.eup %2129  ;;  %2149 = vpow2.f32 %v1828_v60  ;;  %vm2583_vm8 = vcmp.eq.s32.totalorder %v789_v55, 15 }
  0x2d   : > { %v2132_v63 = vpop.eup %2131  ;;  %v557_v0 = vadd.f32 1.0, %v2130_v62  ;;  %2151 = vpow2.f32 %v1829_v61 }
  0x2e   : > { %v2134_v1 = vpop.eup %2133  ;;  %v558_v2 = vadd.f32 1.0, %v2132_v63 }
  0x2f   : > { %v2136_v3 = vpop.eup %2135  ;;  %2153 = vrcp.f32 %v557_v0  ;;  %v559_v4 = vadd.f32 1.0, %v2134_v1 }
  0x30   : > { %v2138_v5 = vpop.eup %2137  ;;  %2155 = vrcp.f32 %v558_v2  ;;  %v560_v6 = vadd.f32 1.0, %v2136_v3  ;;  %v2122_v2 = vld [vmem:[%s2821_s4 + $0x58] sm:$0xff]   ;;  %v2488_v3 = vld [vmem:[%s2821_s4 + $0x60] sm:$0xff]  }
  0x31   : > { %v2140_v8 = vpop.eup %2139  ;;  %2157 = vrcp.f32 %v559_v4  ;;  %v561_v9 = vadd.f32 1.0, %v2138_v5  ;;  %1931 = vmatprep.subr.bf16.mxu1 %v2122_v2  ;;  %1961 = vmatprep.subr.bf16.mxu0 %v2488_v3 }
  0x32   : > { %v2142_v10 = vpop.eup %2141  ;;  %2159 = vrcp.f32 %v560_v6  ;;  %v562_v11 = vadd.f32 1.0, %v2140_v8  ;;  %1932 = vmatpush3.bf16.msra.mxu1 %v2122_v2 }
  0x33   : > { %v2144_v12 = vpop.eup %2143  ;;  %2161 = vrcp.f32 %v561_v9  ;;  %v563_v14 = vadd.f32 1.0, %v2142_v10  ;;  %1981 = vmatprep.subr.bf16.mxu1 %v2488_v3 }
  0x34   : > { %v2146_v15 = vpop.eup %2145  ;;  %2163 = vrcp.f32 %v562_v11  ;;  %v564_v17 = vadd.f32 1.0, %v2144_v12 }
  0x35   : > { %v2148_v18 = vpop.eup %2147  ;;  %2165 = vrcp.f32 %v563_v14  ;;  %v565_v20 = vadd.f32 1.0, %v2146_v15 }
  0x36   : > { %v2150_v23 = vpop.eup %2149  ;;  %2167 = vrcp.f32 %v564_v17  ;;  %v566_v26 = vadd.f32 1.0, %v2148_v18 }
  0x37   : > { %v2152_v27 = vpop.eup %2151  ;;  %2169 = vrcp.f32 %v565_v20  ;;  %v567_v29 = vadd.f32 1.0, %v2150_v23 }
  0x38   : > { %2171 = vrcp.f32 %v566_v26  ;;  %v568_v40 = vadd.f32 1.0, %v2152_v27 }
  0x39   : > { %v2154_v42 = vpop.eup %2153  ;;  %2173 = vrcp.f32 %v567_v29 }
  0x3a   : > { %v2156_v47 = vpop.eup %2155  ;;  %v593_v48 = vmul.f32 %v2154_v42, %v2374_v31  ;;  %2175 = vrcp.f32 %v568_v40 }
  0x3b   : > { %v2158_v50 = vpop.eup %2157  ;;  %v594_v52 = vmul.f32 %v2156_v47, %v2376_v32  ;;  %v803_v32 = vand.u32 15, %v2436_v41 }
  0x3c   : > { %v2160_v59 = vpop.eup %2159  ;;  %v2460_v31 = vsel %vm2438_vm0, 0.0, %v593_v48  ;;  %v2463_v60 = vmul.f32 %v2158_v50, %v2378_v33 }
  0x3d   : > { %v2162_v62 = vpop.eup %2161  ;;  %v2472_v63 = vsel %vm2438_vm0, 0.0, %v594_v52  ;;  %v951_v0 = vrot.slane %v2460_v31, 1  ;;  %v2476_v1 = vmul.f32 %v2160_v59, %v2380_v34  ;;  %v878_v18 = vrot.slane %v2460_v31, 7 }
  0x3e   : > { %v2164_v4 = vpop.eup %2163  ;;  %v952_v5 = vrot.slane %v2472_v63, 1  ;;  %v2051_v34 = vpack.i.bf16 %v2472_v63, %v2460_v31  ;;  %v953_v6 = vrot.slane %v2463_v60, 1  ;;  %v2501_v11 = vmul.f32 %v2162_v62, %v2382_v36 }
  0x3f   : > { %v2166_v9 = vpop.eup %2165  ;;  %v2056_v10 = vpack.i.bf16 %v2476_v1, %v2463_v60  ;;  %v954_v12 = vrot.slane %v2476_v1, 1  ;;  %v2514_v15 = vmul.f32 %v2164_v4, %v2384_v37  ;;  %v879_v27 = vrot.slane %v2472_v63, 7 }
  0x40   : > { %v2168_v13 = vpop.eup %2167  ;;  %2052 = vrot.lane.b32.xlu0 %v2051_v34, %s2217_s19  ;;  %v973_v14 = vsel %vm963_vm1, %v952_v5, %v953_v6  ;;  %v974_v36 = vsel %vm963_vm1, %v951_v0, %v952_v5  ;;  %v2517_v16 = vmul.f32 %v2166_v9, %v2386_v38  ;;  %v955_v20 = vrot.slane %v2501_v11, 1 }
  0x41   : > { %v2170_v17 = vpop.eup %2169  ;;  %v1001_v19 = vsel %vm2452_vm2, 0.0, %v973_v14  ;;  %v2524_v21 = vmul.f32 %v2168_v13, %v2388_v39  ;;  %v972_v37 = vsel %vm963_vm1, %v953_v6, %v954_v12  ;;  %v956_v38 = vrot.slane %v2514_v15, 1 }
  0x42   : > { %v2172_v22 = vpop.eup %2171  ;;  %v2061_v23 = vpack.i.bf16 %v1001_v19, %v974_v36  ;;  %v957_v24 = vrot.slane %v2517_v16, 1  ;;  %v971_v28 = vsel %vm963_vm1, %v954_v12, %v955_v20  ;;  %v2535_v39 = vmul.f32 %v2170_v17, %v2399_v51 }
  0x43   : > { %v2174_v26 = vpop.eup %2173  ;;  %v958_v29 = vrot.slane %v2524_v21, 1  ;;  %v1003_v40 = vsel %vm2465_vm3, 0.0, %v971_v28  ;;  %v2071_v42 = vpack.i.bf16 %v2514_v15, %v2501_v11  ;;  %v602_v51 = vmul.f32 %v2172_v22, %v2402_v56 }
  0x44   : > { %v2176_v35 = vpop.eup %2175  ;;  %2062 = vrot.lane.b32.xlu1 %v2061_v23, %s2218_s20  ;;  %2057 = vrot.lane.b32.xlu0 %v2056_v10, %s2217_s19  ;;  %v969_v43 = vsel %vm963_vm1, %v956_v38, %v957_v24  ;;  %v2066_v44 = vpack.i.bf16 %v1003_v40, %v972_v37  ;;  %v970_v45 = vsel %vm963_vm1, %v955_v20, %v956_v38  ;;  %v959_v47 = vrot.slane %v2535_v39, 1 }
  0x45   : > { %v1005_v46 = vsel %vm2478_vm4, 0.0, %v969_v43  ;;  %v881_v48 = vrot.slane %v2476_v1, 7  ;;  %v2081_v50 = vpack.i.bf16 %v2524_v21, %v2517_v16  ;;  %v603_v56 = vmul.f32 %v2174_v26, %v2404_v57 }
  0x46   : > { %v967_v53 = vsel %vm963_vm1, %v958_v29, %v959_v47  ;;  %v960_v54 = vrot.slane %v602_v51, 1  ;;  %v604_v59 = vmul.f32 %v2176_v35, %v2406_v58  ;;  %v2567_v61 = vsel %vm890_vm6, %v878_v18, %v879_v27 }
  0x47   : > { %v2076_v25 = vpack.i.bf16 %v1005_v46, %v970_v45  ;;  %v968_v49 = vsel %vm963_vm1, %v957_v24, %v958_v29  ;;  %v720_v57 = vsel %vm2494_vm5, 0.0, %v603_v56  ;;  %v882_v62 = vrot.slane %v2501_v11, 7 }
  0x48   : > { %2067 = vrot.lane.b32.xlu1 %v2066_v44, %s2218_s20  ;;  %2072 = vrot.lane.b32.xlu0 %v2071_v42, %s2217_s19  ;;  %v1007_v58 = vsel %vm2557_vm7, 0.0, %v967_v53  ;;  %v961_v63 = vrot.slane %v720_v57, 1  ;;  %v721_v1 = vsel %vm2494_vm5, 0.0, %v604_v59  ;;  %v883_v33 = vrot.slane %v2514_v15, 7 }
  0x49   : > { %v889_v4 = vrot.slane %v721_v1, 7  ;;  %v962_v5 = vrot.slane %v721_v1, 1  ;;  %v2589_v34 = vsel %vm890_vm6, %v881_v48, %v882_v62  ;;  %v880_v9 = vrot.slane %v2463_v60, 7 }
  0x4a   : > { %v965_v6 = vsel %vm963_vm1, %v960_v54, %v961_v63  ;;  %v2595_v8 = vsel %vm890_vm6, %v882_v62, %v883_v33  ;;  %v2086_v30 = vpack.i.bf16 %v1007_v58, %v968_v49  ;;  %v2091_v55 = vpack.i.bf16 %v602_v51, %v2535_v39 }
  0x4b   : > { %v902_v10 = vsel %vm890_vm6, %v889_v4, %v878_v18  ;;  %v966_v11 = vsel %vm963_vm1, %v959_v47, %v960_v54  ;;  %v1009_v12 = vsel %vm2583_vm8, 0.0, %v965_v6  ;;  %v899_v13 = vsel %vm890_vm6, %v880_v9, %v881_v48 }
  0x4c   : > { %2077 = vrot.lane.b32.xlu1 %v2076_v25, %s2218_s20  ;;  %2082 = vrot.lane.b32.xlu0 %v2081_v50, %s2217_s19  ;;  %vm2611_vm9 = vcmp.eq.s32.totalorder %v803_v32, 15  ;;  %v975_v14 = vsel %vm963_vm1, %v962_v5, %v951_v0  ;;  %v900_v36 = vsel %vm890_vm6, %v879_v27, %v880_v9  ;;  %v884_v15 = vrot.slane %v2517_v16, 7 }
  0x4d   : > { %v885_v17 = vrot.slane %v2524_v21, 7  ;;  %v886_v18 = vrot.slane %v2535_v39, 7  ;;  %v2096_v41 = vpack.i.bf16 %v1009_v12, %v966_v11  ;;  %v2101_v32 = vpack.i.bf16 %v721_v1, %v720_v57 }
  0x4e   : > { %v2628_v31 = vsel %vm890_vm6, %v883_v33, %v884_v15  ;;  %v887_v0 = vrot.slane %v602_v51, 7  ;;  %v964_v19 = vsel %vm963_vm1, %v961_v63, %v962_v5  ;;  %v1011_v16 = vsel %vm2611_vm9, 0.0, %v975_v14 }
  0x4f   : > { %v2636_v20 = vsel %vm890_vm6, %v884_v15, %v885_v17  ;;  %v2640_v21 = vsel %vm890_vm6, %v885_v17, %v886_v18  ;;  %v888_v23 = vrot.slane %v720_v57, 7  ;;  %v2106_v37 = vpack.i.bf16 %v1011_v16, %v964_v19  ;;  %v2124_v17 = vld [vmem:[%s2821_s4 + $0x68] sm:$0xff]  }
  0x50   : > { %2087 = vrot.lane.b32.xlu1 %v2086_v30, %s2218_s20  ;;  %2092 = vrot.lane.b32.xlu0 %v2091_v55, %s2217_s19  ;;  %v2644_v22 = vsel %vm890_vm6, %v886_v18, %v887_v0  ;;  %v608_v26 = vadd.s32 16, %v2328_v7  ;;  %v726_v27 = vand.u32 15, %v2328_v7  ;;  %v610_v28 = vadd.s32 32, %v2328_v7 }
  0x51   : > { %v2650_v38 = vsel %vm890_vm6, %v888_v23, %v889_v4  ;;  %v2654_v24 = vsel %vm890_vm6, %v887_v0, %v888_v23  ;;  %v612_v35 = vadd.s32 48, %v2328_v7  ;;  %v614_v47 = vadd.s32 64, %v2328_v7 }
  0x52   : > { %v740_v39 = vand.u32 15, %v608_v26  ;;  %vm866_vm10 = vcmp.eq.s32.totalorder %v726_v27, 0  ;;  %v754_v29 = vand.u32 15, %v610_v28  ;;  %v616_v6 = vadd.s32 80, %v2328_v7 }
  0x53   : > { %v927_v51 = vsel %vm866_vm10, 0.0, %v902_v10  ;;  %v768_v46 = vand.u32 15, %v612_v35  ;;  %vm1581_vm3 = vcmask 1040384   ;;  %vm1586_vm4 = vcmask (!%p1885_p12), 254976  }
  0x54   : > { %2097 = vrot.lane.b32.xlu1 %v2096_v41, %s2218_s20  ;;  %2102 = vrot.lane.b32.xlu0 %v2101_v32, %s2217_s19  ;;  %vm2661_vm12 = vcmp.eq.s32.totalorder %v740_v39, 0  ;;  %vm2665_vm13 = vcmp.eq.s32.totalorder %v754_v29, 0  ;;  %v796_v18 = vand.u32 15, %v616_v6  ;;  %v2125_v39 = vld [vmem:[%s2821_s4 + $0x70] sm:$0xff]  }
  0x55   : > { %v929_v53 = vsel %vm2661_vm12, 0.0, %v900_v36  ;;  %v931_v57 = vsel %vm2665_vm13, 0.0, %v2589_v34  ;;  %vm2680_vm0 = vcmp.eq.s32.totalorder %v768_v46, 0 }
  0x56   : > { %v933_v12 = vsel %vm2680_vm0, 0.0, %v2628_v31  ;;  %vm2717_vm2 = vcmp.eq.s32.totalorder %v796_v18, 0 }
  0x58   : > { %2107 = vrot.lane.b32.xlu1 %v2106_v37, %s2218_s20 }
  0xb2   : > { %v2053_v40 = vpop.permute.xlu0 %2052 }
  0xb3   : > { %v2055_v42 = vunpack.i.h.bf16 %v2053_v40  ;;  %v2054_v43 = vunpack.i.l.bf16 %v2053_v40 }
  0xb5   : > { %v1077_v52 = vsel %vm1076_vm11, %v927_v51, %v2054_v43  ;;  %v1078_v56 = vsel %vm1076_vm11, %v2567_v61, %v2055_v42  ;;  %v782_v61 = vand.u32 15, %v614_v47  ;;  %v937_v47 = vsel %vm2717_vm2, 0.0, %v2654_v24 }
  0xb6   : > { %v2063_v48 = vpop.permute.xlu1 %2062  ;;  %v2058_v50 = vpop.permute.xlu0 %2057 }
  0xb7   : > { %v2065_v54 = vunpack.i.h.bf16 %v2063_v48  ;;  %v2064_v59 = vunpack.i.l.bf16 %v2063_v48  ;;  %v2060_v25 = vunpack.i.h.bf16 %v2058_v50  ;;  %v2059_v49 = vunpack.i.l.bf16 %v2058_v50 }
  0xb8   : > { %vm2693_vm1 = vcmp.eq.s32.totalorder %v782_v61, 0 }
  0xb9   : > { %v1086_v62 = vsel %vm1085_vm14, %v1077_v52, %v2064_v59  ;;  %v1087_v58 = vsel %vm1085_vm14, %v1078_v56, %v2065_v54  ;;  %v1079_v4 = vsel %vm1076_vm11, %v929_v53, %v2059_v49  ;;  %v1080_v5 = vsel %vm1076_vm11, %v899_v13, %v2060_v25  ;;  %v2127_v59 = vld [vmem:[%s2821_s4 + $0x80] sm:$0xff]  }
  0xba   : > { %v2068_v1 = vpop.permute.xlu1 %2067  ;;  %v1094_v33 = vpack.c.bf16 %v1087_v58, %v1086_v62  ;;  %v2073_v2 = vpop.permute.xlu0 %2072  ;;  %v935_v16 = vsel %vm2693_vm1, 0.0, %v2640_v21 }
  0xbb   : > { %v2070_v9 = vunpack.i.h.bf16 %v2068_v1  ;;  %v2069_v34 = vunpack.i.l.bf16 %v2068_v1  ;;  %v2075_v30 = vunpack.i.h.bf16 %v2073_v2  ;;  %v2074_v55 = vunpack.i.l.bf16 %v2073_v2 }
  0xbc   : > { %1953 = vmatprep.mubr.msk.bf16.mxu0 %vm1180_vm15, %v1094_v33 }
  0xbd   : > { %v1088_v10 = vsel %vm1085_vm14, %v1079_v4, %v2069_v34  ;;  %v1089_v11 = vsel %vm1085_vm14, %v1080_v5, %v2070_v9  ;;  %v1082_v7 = vsel %vm1076_vm11, %v2595_v8, %v2075_v30  ;;  %v1081_v13 = vsel %vm1076_vm11, %v931_v57, %v2074_v55 }
  0xbe   : > { %v2078_v14 = vpop.permute.xlu1 %2077  ;;  %v1095_v36 = vpack.c.bf16 %v1089_v11, %v1088_v10  ;;  %v2083_v15 = vpop.permute.xlu0 %2082 }
  0xbf   : > { %v2080_v41 = vunpack.i.h.bf16 %v2078_v14  ;;  %v2079_v32 = vunpack.i.l.bf16 %v2078_v14  ;;  %v2085_v31 = vunpack.i.h.bf16 %v2083_v15  ;;  %v2084_v0 = vunpack.i.l.bf16 %v2083_v15  ;;  %v1884_v15 = vld [vmem:[%s2822_s5] ss:$0 sm:$0xff] }
  0xc0   : > { %1933 = vmatprep.mubr.msk.bf16.mxu1 %vm1180_vm15, %v1095_v36  ;;  %1954 = vmatmul.mubr.msk.bf16.vlgmr.msra.gmra.mrb[0].mxu0 %vm1180_vm15, %v1095_v36 }
  0xc1   : > { %v1091_v8 = vsel %vm1085_vm14, %v1082_v7, %v2080_v41  ;;  %v1090_v19 = vsel %vm1085_vm14, %v1081_v13, %v2079_v32  ;;  %1962 = vmatpush3.bf16.msra.mxu0 %v2488_v3  ;;  %v1084_v37 = vsel %vm1076_vm11, %v2636_v20, %v2085_v31  ;;  %v1083_v26 = vsel %vm1076_vm11, %v933_v12, %v2084_v0 }
  0xc2   : > { %v1096_v23 = vpack.c.bf16 %v1091_v8, %v1090_v19  ;;  %v2088_v27 = vpop.permute.xlu1 %2087  ;;  %1963 = vmatprep.subr.bf16.mxu0 %v2124_v17  ;;  %v2093_v28 = vpop.permute.xlu0 %2092 }
  0xc3   : > { %v2090_v35 = vunpack.i.h.bf16 %v2088_v27  ;;  %v2089_v40 = vunpack.i.l.bf16 %v2088_v27  ;;  %v2095_v21 = vunpack.i.h.bf16 %v2093_v28  ;;  %v2094_v42 = vunpack.i.l.bf16 %v2093_v28 }
  0xc4   : > { %1934 = vmatmul.mubr.msk.bf16.vlgmr.msra.gmra.mrb[0].mxu1 %vm1180_vm15, %v1096_v23  ;;  %1957 = vmatprep.mubr.msk.bf16.mxu0 %vm1180_vm15, %v1096_v23 }
  0xc5   : > { %v1093_v20 = vsel %vm1085_vm14, %v1084_v37, %v2090_v35  ;;  %v1092_v43 = vsel %vm1085_vm14, %v1083_v26, %v2089_v40  ;;  %1987 = vmatpush3.bf16.msra.mxu1 %v2488_v3  ;;  %1964 = vmatpush3.bf16.msra.mxu0 %v2124_v17  ;;  %v1127_v44 = vsel %vm1076_vm11, %v2644_v22, %v2095_v21  ;;  %v2126_v3 = vld [vmem:[%s2821_s4 + $0x78] sm:$0xff]  }
  0xc6   : > { %v1097_v51 = vpack.c.bf16 %v1093_v20, %v1092_v43  ;;  %v1126_v45 = vsel %vm1076_vm11, %v935_v16, %v2094_v42  ;;  %v2098_v46 = vpop.permute.xlu1 %2097  ;;  %1982 = vmatprep.subr.bf16.mxu1 %v2124_v17  ;;  %1965 = vmatprep.subr.bf16.mxu0 %v2125_v39  ;;  %v2103_v48 = vpop.permute.xlu0 %2102 }
  0xc7   : > { %v2100_v50 = vunpack.i.h.bf16 %v2098_v46  ;;  %v2099_v52 = vunpack.i.l.bf16 %v2098_v46  ;;  %v2105_v56 = vunpack.i.h.bf16 %v2103_v48  ;;  %v2104_v53 = vunpack.i.l.bf16 %v2103_v48 }
  0xc8   : > { %1958 = vmatmul.mubr.msk.bf16.gmra.mrb[4].mxu0 %vm1180_vm15, %v1097_v51  ;;  %1937 = vmatprep.mubr.msk.bf16.mxu1 %vm1180_vm15, %v1097_v51 }
  0xc9   : > { %v1129_v22 = vsel %vm1085_vm14, %v1127_v44, %v2100_v50  ;;  %v1128_v54 = vsel %vm1085_vm14, %v1126_v45, %v2099_v52  ;;  %1988 = vmatpush3.bf16.msra.mxu1 %v2124_v17  ;;  %1966 = vmatpush3.bf16.msra.mxu0 %v2125_v39  ;;  %v1379_v25 = vsel %vm1076_vm11, %v2650_v38, %v2105_v56  ;;  %v2128_v38 = vld [vmem:[%s2821_s4 + $0x88] sm:$0xff]  }
  0xca   : > { %v1130_v24 = vpack.c.bf16 %v1129_v22, %v1128_v54  ;;  %1973 = vmatprep.mubr.msk.bf16.mxu0 %vm1180_vm15, %v1096_v23  ;;  %1983 = vmatprep.subr.bf16.mxu1 %v2125_v39  ;;  %v1378_v49 = vsel %vm1076_vm11, %v937_v47, %v2104_v53  ;;  %v2108_v57 = vpop.permute.xlu1 %2107 }
  0xcb   : > { %1967 = vmatprep.subr.bf16.mxu0 %v2126_v3  ;;  %v2110_v62 = vunpack.i.h.bf16 %v2108_v57  ;;  %v2109_v58 = vunpack.i.l.bf16 %v2108_v57 }
  0xcc   : > { %1938 = vmatmul.mubr.msk.bf16.gmra.mrb[4].mxu1 %vm1180_vm15, %v1130_v24 }
  0xcd   : > { %1989 = vmatpush3.bf16.msra.mxu1 %v2125_v39  ;;  %1968 = vmatpush3.bf16.msra.mxu0 %v2126_v3  ;;  %v1381_v63 = vsel %vm1085_vm14, %v1379_v25, %v2110_v62  ;;  %v1380_v61 = vsel %vm1085_vm14, %v1378_v49, %v2109_v58 }
  0xce   : > { %1984 = vmatprep.subr.bf16.mxu1 %v2126_v3  ;;  %1969 = vmatprep.subr.bf16.mxu0 %v2127_v59  ;;  %v1382_v1 = vpack.c.bf16 %v1381_v63, %v1380_v61 }
  0xcf   : > { %1977 = vmatprep.mubr.msk.bf16.mxu1 %vm1180_vm15, %v1130_v24 }
  0xd1   : > { %1990 = vmatpush3.bf16.msra.mxu1 %v2126_v3  ;;  %1970 = vmatpush3.bf16.msra.mxu0 %v2127_v59 }
  0xd2   : > { %1985 = vmatprep.subr.bf16.mxu1 %v2127_v59  ;;  %1971 = vmatprep.subr.bf16.mxu0 %v2128_v38 }
  0xd5   : > { %1991 = vmatpush3.bf16.msra.mxu1 %v2127_v59  ;;  %1972 = vmatpush3.bf16.msra.mxu0 %v2128_v38 }
  0xd6   : > { %1986 = vmatprep.subr.bf16.mxu1 %v2128_v38 }
  0xd8   : > { %1974 = vmatmul.mubr.msk.bf16.vlgmr.msra.gmra.mrb[0].mxu0 %vm1180_vm15, %v1097_v51 }
  0xd9   : > { %1992 = vmatpush3.bf16.msra.mxu1 %v2128_v38 }
  0xdc   : > { %1978 = vmatmul.mubr.msk.bf16.vlgmr.msra.gmra.mrb[8].mxu1 %vm1180_vm15, %v1382_v1 }
 0x197   : > { %v1935_v33 = vpop.f32.mrb[0].mxu1 }
 0x198   : > { %v1227_v2 = vpop.f32.mrb[1].mxu1 }
 0x199   : > { %v1936_v4 = vpop.f32.mrb[2].mxu1 }
 0x19a   : > { %v1230_v5 = vpop.f32.mrb[3].mxu1 }
 0x19b   : > { %v1959_v6 = vpop.f32.mrb[4].mxu0 }
 0x19c   : > { %v1347_v9 = vpop.f32.mrb[5].mxu0 }
 0x19d   : > { %v1960_v34 = vpop.f32.mrb[6].mxu0 }
 0x19e   : > { %v1350_v30 = vpop.f32.mrb[7].mxu0 }
 0x19f   : > { %v1939_v55 = vpop.f32.mrb[4].mxu1 }
 0x1a0   : > { %v1356_v10 = vadd.f32 %v1959_v6, %v1939_v55  ;;  %v1243_v11 = vpop.f32.mrb[5].mxu1 }
 0x1a1   : > { %v1348_v12 = vadd.f32 %v1347_v9, %v1243_v11  ;;  %v1940_v60 = vpop.f32.mrb[6].mxu1 }
 0x1a2   : > { %v1359_v7 = vadd.f32 %v1960_v34, %v1940_v60  ;;  %v1246_v13 = vpop.f32.mrb[7].mxu1 }
 0x1a3   : > { %v1351_v14 = vadd.f32 %v1350_v30, %v1246_v13 }
 0x1ab   : > { %v1975_v36 = vpop.f32.mrb[0].mxu0 }
 0x1ac   : > { %v1993_v17 = vadd.f32 %v1975_v36, %v1935_v33  ;;  %v1469_v18 = vpop.f32.mrb[1].mxu0 }
 0x1ad   : > { %v1994_v41 = vadd.f32 %v1469_v18, %v1227_v2  ;;  %v1976_v32 = vpop.f32.mrb[2].mxu0 }
 0x1ae   : > { %v1517_v31 = vadd.f32 %v1993_v17, %v1884_v15  ;;  %v1995_v0 = vadd.f32 %v1976_v32, %v1936_v4  ;;  %v1472_v8 = vpop.f32.mrb[3].mxu0 }
 0x1af   : > { %v1515_v19 = vadd.f32 %v1994_v41, %v1884_v15  ;;  %v1996_v16 = vadd.f32 %v1472_v8, %v1230_v5  ;;  %v1979_v23 = vpop.f32.mrb[8].mxu1 }
 0x1b0   : > { %1525 = vst.msk [vmem:[%s2763_s11 + $0x10] sm:$0xff] %vm1076_vm11, %v1517_v31  ;;  %v1518_v37 = vadd.f32 %v1995_v0, %v1884_v15  ;;  %v1506_v26 = vadd.f32 %v1979_v23, %v1356_v10  ;;  %v1485_v27 = vpop.f32.mrb[9].mxu1  ;;  %v1554_v40 = vmul.f32 %v1517_v31, %v1517_v31  ;;  %v1534_v45 = vsel %vm1076_vm11, %v1517_v31, 0.0 }
 0x1b1   : > { %1523 = vst.msk [vmem:[%s2763_s11] sm:$0xff] %vm1076_vm11, %v1515_v19  ;;  %v1552_v28 = vmul.f32 %v1515_v19, %v1515_v19  ;;  %v1516_v39 = vadd.f32 %v1996_v16, %v1884_v15  ;;  %v1504_v29 = vadd.f32 %v1485_v27, %v1348_v12  ;;  %v1980_v35 = vpop.f32.mrb[10].mxu1  ;;  %v1531_v20 = vsel %vm1076_vm11, %v1515_v19, 0.0 }
 0x1b2   : > { %1526 = vst.msk [vmem:[%s2763_s11 + $0x18] sm:$0xff] %vm1076_vm11, %v1518_v37  ;;  %v1521_v21 = vadd.f32 %v1884_v15, %v1506_v26  ;;  %v1488_v42 = vpop.f32.mrb[11].mxu1  ;;  %v1555_v48 = vmul.f32 %v1518_v37, %v1518_v37  ;;  %v1507_v52 = vadd.f32 %v1980_v35, %v1359_v7  ;;  %v1563_v22 = vsel %vm1076_vm11, %v1554_v40, 0.0 }
 0x1b3   : > { %1524 = vst.msk [vmem:[%s2763_s11 + $0x8] sm:$0xff] %vm1076_vm11, %v1516_v39  ;;  %v1532_v43 = vsel %vm1076_vm11, %v1516_v39, 0.0  ;;  %v1553_v51 = vmul.f32 %v1516_v39, %v1516_v39  ;;  %v1519_v44 = vadd.f32 %v1884_v15, %v1504_v29  ;;  %v1560_v47 = vsel %vm1076_vm11, %v1552_v28, 0.0 }
 0x1b4   : > { %v1533_v46 = vadd.f32 %v1532_v43, %v1531_v20  ;;  %1529 = vst.msk [vmem:[%s2763_s11 + $0x30] sm:$0xff] %vm1076_vm11, %v1521_v21  ;;  %v1505_v53 = vadd.f32 %v1488_v42, %v1351_v14  ;;  %v1536_v54 = vsel %vm1076_vm11, %v1518_v37, 0.0  ;;  %v1522_v59 = vadd.f32 %v1884_v15, %v1507_v52 }
 0x1b5   : > { %v1561_v50 = vsel %vm1076_vm11, %v1553_v51, 0.0  ;;  %1527 = vst.msk [vmem:[%s2763_s11 + $0x20] sm:$0xff] %vm1076_vm11, %v1519_v44  ;;  %v1556_v24 = vmul.f32 %v1519_v44, %v1519_v44  ;;  %v1565_v62 = vsel %vm1076_vm11, %v1555_v48, 0.0  ;;  %v1538_v58 = vsel %vm1076_vm11, %v1519_v44, 0.0 }
 0x1b6   : > { %v1535_v3 = vadd.f32 %v1534_v45, %v1533_v46  ;;  %v1562_v56 = vadd.f32 %v1561_v50, %v1560_v47  ;;  %v1520_v57 = vadd.f32 %v1884_v15, %v1505_v53  ;;  %1530 = vst.msk [vmem:[%s2763_s11 + $0x38] sm:$0xff] %vm1076_vm11, %v1522_v59  ;;  %v1558_v1 = vmul.f32 %v1521_v21, %v1521_v21 }
 0x1b7   : > { %v1567_v33 = vsel %vm1076_vm11, %v1556_v24, 0.0  ;;  %v1542_v6 = vsel %vm1076_vm11, %v1521_v21, 0.0  ;;  %v1559_v9 = vmul.f32 %v1522_v59, %v1522_v59  ;;  %v1544_v11 = vsel %vm1076_vm11, %v1522_v59, 0.0 }
 0x1b8   : > { %v1564_v25 = vadd.f32 %v1563_v22, %v1562_v56  ;;  %v1537_v49 = vadd.f32 %v1536_v54, %v1535_v3  ;;  %1528 = vst.msk [vmem:[%s2763_s11 + $0x28] sm:$0xff] %vm1076_vm11, %v1520_v57  ;;  %v1557_v38 = vmul.f32 %v1520_v57, %v1520_v57  ;;  %v1540_v2 = vsel %vm1076_vm11, %v1520_v57, 0.0 }
 0x1b9   : > { %v1571_v10 = vsel %vm1076_vm11, %v1558_v1, 0.0  ;;  %v1573_v7 = vsel %vm1076_vm11, %v1559_v9, 0.0 }
 0x1ba   : > { %v1539_v63 = vadd.f32 %v1538_v58, %v1537_v49  ;;  %v1566_v61 = vadd.f32 %v1565_v62, %v1564_v25  ;;  %v1569_v34 = vsel %vm1076_vm11, %v1557_v38, 0.0 }
 0x1bc   : > { %v1568_v4 = vadd.f32 %v1567_v33, %v1566_v61  ;;  %v1541_v5 = vadd.f32 %v1540_v2, %v1539_v63 }
 0x1be   : > { %v1543_v30 = vadd.f32 %v1542_v6, %v1541_v5  ;;  %v1570_v55 = vadd.f32 %v1569_v34, %v1568_v4 }
 0x1c0   : > { %v1545_v12 = vadd.f32 %v1544_v11, %v1543_v30  ;;  %v1572_v60 = vadd.f32 %v1571_v10, %v1570_v55 }
 0x1c2   : > { %v1546_v13 = vrot.slane %v1545_v12, 4  ;;  %v1574_v14 = vadd.f32 %v1573_v7, %v1572_v60 }
 0x1c4   : > { %v1547_v36 = vadd.f32 %v1546_v13, %v1545_v12  ;;  %v1575_v15 = vrot.slane %v1574_v14, 4 }
 0x1c6   : > { %v1548_v17 = vrot.slane %v1547_v36, 2  ;;  %v1576_v18 = vadd.f32 %v1575_v15, %v1574_v14 }
 0x1c8   : > { %v1549_v41 = vadd.f32 %v1548_v17, %v1547_v36  ;;  %v1577_v32 = vrot.slane %v1576_v18, 2 }
 0x1ca   : > { %v1550_v31 = vrot.slane %v1549_v41, 1  ;;  %v1578_v0 = vadd.f32 %v1577_v32, %v1576_v18  ;;  %1585 = sbr.rel (%p1885_p12) target bundleno = 466 (0x1d2), region = 48 }
 0x1cc   : > { %v1579_v8 = vrot.slane %v1578_v0, 1  ;;  %v1551_v19 = vadd.f32 %v1550_v31, %v1549_v41 }
 0x1ce   : > { %v1580_v16 = vadd.f32 %v1579_v8, %v1578_v0 }
 0x1d0   : > { %v1582_v23 = vsel %vm1581_vm3, %v1551_v19, %v1580_v16 }
 0x1d1   : > { %1587 = vst.msk [vmem:[%s2366_s18] sm:$0x3] %vm1586_vm4, %v1582_v23 }
 0x1d2 PF: > { %p1886_p13 = scmp.le.s32.totalorder %s2199_s24, 0 }
 0x1d3   : > { %vm1594_vm5 = vcmask (!%p1886_p13), 254976  }
 0x1d4   : > { %1591 = sbr.rel (%p1886_p13) target bundleno = 476 (0x1dc), region = 52 }
 0x1d8   : > { %v1592_v37 = vld [vmem:[%s2366_s18] sm:$0x3] (!%p1886_p13) }
 0x1d9   : > { %v1593_v26 = vadd.f32 (!%p1886_p13), %v1592_v37, %v1582_v23 }
 0x1db   : > { %1595 = vst.msk [vmem:[%s2366_s18] sm:$0x3] %vm1594_vm5, %v1593_v26 }
 0x1dc PF: > { %s18_s28 = sadd.s32 1, %s2215_s28   ;;  %s2852_s24 = smov %s2207_s26 }
 0x1dd   : > { %p15_p0 = scmp.ge.s32.totalorder %s18_s28, 10   ;;  %s2853_s25 = smov %s2211_s27 }
 0x1de   : > { %s2854_s26 = smov %s2857_s29  ;;  %s2855_s27 = smov %s2861_s30 }
 0x1df   :  { %17 = sbr.rel (!%p15_p0) target bundleno = 3 (0x3), region = 105 }

// kernel: res_block_forward.7
= control target key start
LH: loop header
LB: loop body
LE: loop exit
PB: predicated region body
PF: predicated region fallthrough
CT: control target
= control target key end

     0   :  { %12 = vsyncpa [#allocation3], 0  ;;  %s2993_s0 = inlined_call_operand.vmem [shape: f32[2,16,16,32], index: 0, kind: input, shape index: {}, may-alias: {0,1,2}]   ;;  %s2994_s1 = inlined_call_operand.vmem [shape: f32[2,16,16,32], index: 1, kind: input, shape index: {}, may-alias: {0,1,2}]   ;;  %s2995_s2 = inlined_call_operand.vmem [shape: f32[2,16,16,32], index: 2, kind: input, shape index: {}, may-alias: {0,1,2}]   ;;  %s2996_s3 = inlined_call_operand.vmem [shape: f32[2,2,32], index: 3, kind: input, shape index: {}]   ;;  %s2997_s4 = inlined_call_operand.vmem [shape: bf16[3,96,32], index: 4, kind: input, shape index: {}]   ;;  %s2998_s5 = inlined_call_operand.vmem [shape: f32[1,32], index: 5, kind: input, shape index: {}]   ;;  %s2999_s6 = inlined_call_operand.vmem [shape: f32[2,16,16,32], index: 6, kind: input, shape index: {}]   ;;  %s3000_s7 = inlined_call_operand.hbm [shape: f32[2,16,16,32], index: 7, kind: output, shape index: {}]  }
   0x1   :  { %14 = vsyncpa [#allocation3 + $0x1], 0  ;;  %s2315_s24 = smov 0   ;;  %s2317_s25 = smov 0  }
   0x2   :  { %s2319_s26 = smov 0   ;;  %s2321_s27 = smov 0  }
   0x3   :  { %s2323_s28 = smov 0   ;;  %s2325_s29 = smov 0  }
   0x4   :  { %s2327_s30 = smov 0   ;;  %s2329_s8 = smov 0  }
   0x5 LB: > { %3005 = sst [smem:[#allocation5_spill]] %s2260_s29  ;;  %s1740_s9 = sadd.s32 4294967295, %s2268_s8   ;;  %s2268_s8 = sphi %s2329_s8, %s20_s8   ;;  %s2264_s30 = sphi %s2327_s30, %s3039_s30   ;;  %s2260_s29 = sphi %s2325_s29, %s3038_s29   ;;  %s2256_s28 = sphi %s2323_s28, %s3037_s28   ;;  %s2252_s27 = sphi %s2321_s27, %s3036_s27   ;;  %s2248_s26 = sphi %s2319_s26, %s3042_s26   ;;  %s2244_s25 = sphi %s2317_s25, %s3041_s25   ;;  %s2240_s24 = sphi %s2315_s24, %s3040_s24  }
   0x6   : > { %3006 = sst [smem:[#allocation6_spill]] %s2264_s30  ;;  %s1741_s10 = sadd.s32 4294967294, %s2268_s8  }
   0x7   : > { %s29_s11 = sadd.s32 1, %s2260_s29  ;;  %s32_s12 = sadd.s32 1, %s2264_s30 }
   0x8   : > { %p30_p0 = scmp.ge.s32.totalorder %s29_s11, 4  ;;  %p247_p1 = scmp.ne.s32.totalorder %s2248_s26, %s2244_s25 }
   0x9   : > { %p248_p2 = scmp.eq.s32.totalorder %s1740_s9, 7  ;;  %p253_p5 = scmp.ne.s32.totalorder %s2244_s25, %s2240_s24 }
   0xa   : > { %s3044_s11 = smov (%p30_p0, %s29_s11), 0  ;;  %s3046_s12 = smov (!%p30_p0, %s32_s12), %s2264_s30 }
   0xb   : > { %3007 = sst [smem:[#allocation7_spill]] %s3044_s11  ;;  %s233_s13 = ssub.s32 %s2260_s29, %s3044_s11 }
   0xc   : > { %p2366_p3 = por %p248_p2, %p247_p1  ;;  %p34_p4 = scmp.ge.s32.totalorder %s3046_s12, 2 }
   0xd   : > { %p254_p6 = scmp.eq.s32.totalorder %s1741_s10, 7  ;;  %p1750_p7 = scmp.ge.s32.totalorder %s2268_s8, 1 }
   0xe   : > { %s3048_s12 = smov (%p34_p4, %s3046_s12), 0  ;;  %p353_p9 = scmp.lt.s32.totalorder %s2268_s8, 9 }
   0xf   : > { %3009 = sst [smem:[#allocation8_spill]] %s3048_s12  ;;  %p2375_p8 = por %p254_p6, %p253_p5 }
  0x10   : > { %s232_s16 = ssub.s32 %s2264_s30, %s3048_s12  ;;  %s237_s17 = sadd.s32 1, %s2248_s26 }
  0x11   : > { %s234_s18 = sor.u32 %s233_s13, %s232_s16  ;;  %p354_p10 = pnand %p1750_p7, %p353_p9 }
  0x12   : > { %p235_p11 = scmp.eq.s32.totalorder %s234_s18, 0  ;;  %s2387_s20 = sshll.u32 (!%p354_p10), %s2252_s27, 2  ;;  %v505_v0 = vlaneseq (!%p354_p10)  ;;  %v2108_v1 = vld [vmem:[%s2997_s4] sm:$0xff] (!%p354_p10)   ;;  %v2109_v2 = vld [vmem:[%s2997_s4 + $0x30] sm:$0xff] (!%p354_p10)   ;;  %v2110_v4 = vld [vmem:[%s2997_s4 + $0x8] sm:$0xff] (!%p354_p10)  }
  0x13   : > { %357 = sbr.rel (%p354_p10) target bundleno = 466 (0x1d2), region = 48  ;;  %p434_p12 = scmp.lt.s32.totalorder (!%p354_p10), %s2256_s28, 1  ;;  %1905 = vmatprep.subr.bf16.mxu0 (!%p354_p10), %v2108_v1  ;;  %1885 = vmatprep.subr.bf16.mxu1 (!%p354_p10), %v2109_v2  ;;  %v2111_v7 = vld [vmem:[%s2997_s4 + $0x38] sm:$0xff] (!%p354_p10)   ;;  %v2112_v9 = vld [vmem:[%s2997_s4 + $0x10] sm:$0xff] (!%p354_p10)  }
  0x14   : > { %s2384_s19 = scalar_select %p235_p11, %s2248_s26, %s237_s17  }
  0x15   : > { %p450_p13 = scmp.lt.s32.totalorder (!%p354_p10), %s2387_s20, 15  ;;  %v2398_v3 = vshrl.u32 (!%p354_p10), %v505_v0, 7  ;;  %1906 = vmatpush3.bf16.msra.mxu0 (!%p354_p10), %v2108_v1  ;;  %1886 = vmatpush3.bf16.msra.mxu1 (!%p354_p10), %v2109_v2  ;;  %p646_p4 = scmp.eq.s32.totalorder (!%p354_p10), %s2252_s27, 0 }
  0x16   : > { %1907 = vmatprep.subr.bf16.mxu0 (!%p354_p10), %v2110_v4  ;;  %1887 = vmatprep.subr.bf16.mxu1 (!%p354_p10), %v2111_v7  ;;  %p674_p5 = scmp.eq.s32.totalorder (!%p354_p10), %s2252_s27, 3 }
  0x17   : > { %v507_v5 = vsub.s32 (!%p354_p10), 0, %v2398_v3  ;;  %v523_v6 = vsub.s32 (!%p354_p10), 1, %v2398_v3  ;;  %vm979_vm0 = vcmp.lt.s32.totalorder (!%p354_p10), %v2398_v3, 7  ;;  %vm906_vm5 = vcmp.lt.s32.totalorder (!%p354_p10), %v2398_v3, 1 }
  0x19   : > { %1908 = vmatpush3.bf16.msra.mxu0 (!%p354_p10), %v2110_v4  ;;  %1888 = vmatpush3.bf16.msra.mxu1 (!%p354_p10), %v2111_v7 }
  0x1a   : > { %s435_s10 = scalar_select %p434_p12, %s2256_s28, 1  ;;  %1909 = vmatprep.subr.bf16.mxu0 %v2112_v9 }
  0x1b   : > { %s451_s13 = scalar_select %p450_p13, %s2387_s20, 15 }
  0x1c   : > { %s2404_s18 = sshll.u32 %s435_s10, 5  ;;  %s1773_s21 = sshll.u32 %s435_s10, 1 }
  0x1d   : > { %s1763_s22 = sshll.u32 %s451_s13, 1  ;;  %s478_s12 = scalar_lea.vmem %s2996_s3, %s1773_s21  ;;  %1910 = vmatpush3.bf16.msra.mxu0 %v2112_v9  ;;  %v2114_v9 = vld [vmem:[%s2997_s4 + $0x18] sm:$0xff]  }
  0x1e   : > { %s2415_s16 = sadd.s32 %s1763_s22, %s2404_s18  ;;  %v504_v8 = vld [vmem:[%s478_s12] sm:$0x3]  ;;  %s1753_s10 = sadd.s32 4294967295, %s2387_s20  ;;  %1911 = vmatprep.subr.bf16.mxu0 %v2114_v9 }
  0x1f   : > { %s1765_s13 = sshll.u32 %s2415_s16, 3  ;;  %v2422_v10 = vrot.slane %v504_v8, %v507_v5  ;;  %p432_p0 = scmp.gt.s32.totalorder %s1753_s10, 0  ;;  %v2429_v11 = vrot.slane %v504_v8, %v523_v6  ;;  %v2113_v8 = vld [vmem:[%s2997_s4 + $0x40] sm:$0xff]  }
  0x20   : > { %s456_s30 = scalar_lea.vmem %s2994_s1, %s1765_s13  ;;  %p1754_p1 = scmp.lt.s32.totalorder %s1753_s10, 15  ;;  %1889 = vmatprep.subr.bf16.mxu1 %v2113_v8 }
  0x21   : > { %v494_v12 = vld [vmem:[%s456_s30] sm:$0xff]  ;;  %v495_v13 = vld [vmem:[%s456_s30 + $0x8] sm:$0xff]  ;;  %v496_v14 = vld [vmem:[%s456_s30 + $0x10] sm:$0xff]  ;;  %s433_s29 = scalar_select %p432_p0, %s1753_s10, 0  ;;  %1890 = vmatpush3.bf16.msra.mxu1 %v2113_v8  ;;  %1912 = vmatpush3.bf16.msra.mxu0 %v2114_v9 }
  0x22   : > { %v511_v15 = vmul.f32 %v2422_v10, %v494_v12  ;;  %v512_v16 = vmul.f32 %v2422_v10, %v495_v13  ;;  %v497_v17 = vld [vmem:[%s456_s30 + $0x18] sm:$0xff]  ;;  %v513_v18 = vmul.f32 %v2422_v10, %v496_v14  ;;  %v498_v19 = vld [vmem:[%s456_s30 + $0x20] sm:$0xff]  ;;  %v499_v20 = vld [vmem:[%s456_s30 + $0x28] sm:$0xff]  ;;  %s459_s12 = sadd.s32 4, %s2387_s20  ;;  %v625_v14 = vadd.s32 24, %v2398_v3  ;;  %s1848_s16 = sshll.u32 %s2256_s28, 5 }
  0x23   : > { %v514_v21 = vmul.f32 %v2422_v10, %v497_v17  ;;  %s3050_s29 = smov (!%p1754_p1, %s433_s29), 15  ;;  %v515_v22 = vmul.f32 %v2422_v10, %v498_v19  ;;  %v516_v23 = vmul.f32 %v2422_v10, %v499_v20  ;;  %v500_v24 = vld [vmem:[%s456_s30 + $0x30] sm:$0xff]  ;;  %v501_v25 = vld [vmem:[%s456_s30 + $0x38] sm:$0xff]  ;;  %p2474_p2 = scmp.lt.s32.totalorder %s459_s12, 15  ;;  %v623_v19 = vadd.s32 8, %v2398_v3 }
  0x24   : > { %v2439_v26 = vadd.f32 %v2429_v11, %v511_v15  ;;  %v2442_v27 = vadd.f32 %v2429_v11, %v512_v16  ;;  %v2445_v28 = vadd.f32 %v2429_v11, %v513_v18  ;;  %v517_v29 = vmul.f32 %v2422_v10, %v500_v24  ;;  %s1759_s11 = sshll.u32 %s3050_s29, 1 }
  0x25   : > { %v2449_v30 = vadd.f32 %v2429_v11, %v514_v21  ;;  %v2452_v31 = vadd.f32 %v2429_v11, %v515_v22  ;;  %v2455_v32 = vadd.f32 %v2429_v11, %v516_v23  ;;  %v518_v33 = vmul.f32 %v2422_v10, %v501_v25  ;;  %s440_s22 = sadd.s32 %s2404_s18, %s1759_s11  ;;  %s3052_s12 = smov (!%p2474_p2, %s459_s12), 15 }
  0x26   : > { %v1780_v34 = vmul.f32 -1.442695, %v2439_v26  ;;  %v1781_v35 = vmul.f32 -1.442695, %v2442_v27  ;;  %v1782_v36 = vmul.f32 -1.442695, %v2445_v28  ;;  %v2465_v38 = vadd.f32 %v2429_v11, %v517_v29 }
  0x27   : > { %v1783_v37 = vmul.f32 -1.442695, %v2449_v30  ;;  %s1761_s9 = sshll.u32 %s440_s22, 3  ;;  %v1784_v39 = vmul.f32 -1.442695, %v2452_v31  ;;  %v2472_v40 = vadd.f32 %v2429_v11, %v518_v33  ;;  %s3054_s12 = smov (!%p2474_p2, %s3052_s12), 15 }
  0x28   : > { %2126 = vpow2.f32 %v1780_v34  ;;  %s442_s21 = scalar_lea.vmem %s2993_s0, %s1761_s9  ;;  %v1785_v43 = vmul.f32 -1.442695, %v2455_v32  ;;  %v1786_v46 = vmul.f32 -1.442695, %v2465_v38  ;;  %s1770_s23 = sshll.u32 %s3054_s12, 1  ;;  %v627_v16 = vadd.s32 40, %v2398_v3 }
  0x29   : > { %2128 = vpow2.f32 %v1781_v35  ;;  %v492_v41 = vld [vmem:[%s442_s21] sm:$0xff]  ;;  %v493_v42 = vld [vmem:[%s442_s21 + $0x8] sm:$0xff]  ;;  %v1787_v47 = vmul.f32 -1.442695, %v2472_v40  ;;  %s468_s30 = sadd.s32 %s1770_s23, %s2404_s18  ;;  %v763_v21 = vand.u32 15, %v625_v14  ;;  %v2520_v22 = vadd.s32 56, %v2398_v3 }
  0x2a   : > { %2130 = vpow2.f32 %v1782_v36  ;;  %v509_v44 = vmul.f32 %v2422_v10, %v492_v41  ;;  %v510_v45 = vmul.f32 %v2422_v10, %v493_v42  ;;  %s1772_s29 = sshll.u32 %s468_s30, 3  ;;  %v777_v25 = vand.u32 15, %v627_v16  ;;  %v2116_v42 = vld [vmem:[%s2997_s4 + $0x20] sm:$0xff]   ;;  %s2270_s22 = smov 32  }
  0x2b   : > { %2132 = vpow2.f32 %v1783_v37  ;;  %s470_s9 = scalar_lea.vmem %s2995_s2, %s1772_s29  ;;  %v749_v34 = vand.u32 15, %v623_v19  ;;  %v626_v35 = vadd.s32 32, %v2398_v3  ;;  %v2539_v41 = vadd.s32 88, %v2398_v3  ;;  %1913 = vmatprep.subr.bf16.mxu0 %v2116_v42  ;;  %s2271_s30 = smov 64  }
  0x2c   : > { %v2486_v48 = vadd.f32 %v2429_v11, %v509_v44  ;;  %v2489_v49 = vadd.f32 %v2429_v11, %v510_v45  ;;  %2134 = vpow2.f32 %v1784_v39  ;;  %v502_v53 = vld [vmem:[%s470_s9] sm:$0xff]  ;;  %v503_v54 = vld [vmem:[%s470_s9 + $0x8] sm:$0xff]  ;;  %s2525_s21 = scalar_select %p646_p4, 1, 0  ;;  %v2536_v39 = vadd.s32 72, %v2398_v3  ;;  %1914 = vmatpush3.bf16.msra.mxu0 %v2116_v42 }
  0x2d   : > { %2136 = vpow2.f32 %v1785_v43  ;;  %v519_v57 = vmul.f32 %v2422_v10, %v502_v53  ;;  %v520_v60 = vmul.f32 %v2422_v10, %v503_v54  ;;  %v624_v43 = vadd.s32 16, %v2398_v3  ;;  %s2558_s11 = scalar_select %p674_p5, 1, 0 }
  0x2e   : > { %v1778_v50 = vmul.f32 -1.442695, %v2486_v48  ;;  %v1779_v51 = vmul.f32 -1.442695, %v2489_v49  ;;  %2138 = vpow2.f32 %v1786_v46  ;;  %vm2551_vm1 = vcmp.eq.s32.totalorder %v763_v21, 15  ;;  %s427_s23 = sand.u32 1, %s2244_s25  }
  0x2f   : > { %2140 = vpow2.f32 %v1787_v47  ;;  %v2502_v4 = vadd.f32 %v2429_v11, %v519_v57  ;;  %v2505_v7 = vadd.f32 %v2429_v11, %v520_v60  ;;  %v791_v46 = vand.u32 15, %v2520_v22  ;;  %s1854_s12 = sshll.u32 %s2252_s27, 3 }
  0x30   : > { %2142 = vpow2.f32 %v1778_v50  ;;  %vm2567_vm2 = vcmp.eq.s32.totalorder %v777_v25, 15  ;;  %vm2573_vm3 = vcmp.eq.s32.totalorder %v749_v34, 15 }
  0x31   : > { %2144 = vpow2.f32 %v1779_v51  ;;  %v1788_v17 = vmul.f32 -1.442695, %v2502_v4  ;;  %v1789_v20 = vmul.f32 -1.442695, %v2505_v7  ;;  %vm2618_vm6 = vcmp.eq.s32.totalorder %v791_v46, 15 }
  0x32   : > { %v2127_v52 = vpop.eup %2126 }
  0x33   : > { %v2129_v55 = vpop.eup %2128  ;;  %v575_v56 = vadd.f32 1.0, %v2127_v52  ;;  %v648_v52 = vstv %s2525_s21 }
  0x34   : > { %v2131_v58 = vpop.eup %2130  ;;  %v576_v59 = vadd.f32 1.0, %v2129_v55  ;;  %vm2591_vm4 = vcmp.eq.s32.totalorder %v648_v52, 1 }
  0x35   : > { %v2133_v61 = vpop.eup %2132  ;;  %2146 = vrcp.f32 %v575_v56  ;;  %v577_v62 = vadd.f32 1.0, %v2131_v58  ;;  %v770_v58 = vand.u32 15, %v626_v35  ;;  %v2656_v35 = vld [vmem:[%s2997_s4 + $0x60] sm:$0xff]  }
  0x36   : > { %v2135_v63 = vpop.eup %2134  ;;  %2148 = vrcp.f32 %v576_v59  ;;  %v578_v0 = vadd.f32 1.0, %v2133_v61 }
  0x37   : > { %v2137_v1 = vpop.eup %2136  ;;  %2150 = vrcp.f32 %v577_v62  ;;  %v579_v2 = vadd.f32 1.0, %v2135_v63  ;;  %v2117_v63 = vld [vmem:[%s2997_s4 + $0x50] sm:$0xff]   ;;  %vm2622_vm7 = vcmp.eq.s32.totalorder %v770_v58, 0 }
  0x38   : > { %v2139_v5 = vpop.eup %2138  ;;  %2152 = vrcp.f32 %v578_v0  ;;  %v580_v6 = vadd.f32 1.0, %v2137_v1  ;;  %v756_v0 = vand.u32 15, %v624_v43  ;;  %v630_v1 = vadd.s32 64, %v2398_v3 }
  0x39   : > { %v2141_v10 = vpop.eup %2140  ;;  %2154 = vrcp.f32 %v579_v2  ;;  %v581_v12 = vadd.f32 1.0, %v2139_v5  ;;  %v676_v5 = vstv %s2558_s11  ;;  %s2901_s11 = scalar_lea.vmem %s2999_s6, %s1765_s13  ;;  %s2915_s13 = sadd.s32 %s1854_s12, %s1848_s16 }
  0x3a   : > { %v2143_v13 = vpop.eup %2142  ;;  %2156 = vrcp.f32 %v580_v6  ;;  %v582_v23 = vadd.f32 1.0, %v2141_v10  ;;  %vm2630_vm8 = vcmp.eq.s32.totalorder %v756_v0, 0  ;;  %vm677_vm11 = vcmp.eq.s32.totalorder %v676_v5, 1  ;;  %s1849_s28 = sshll.u32 %s2915_s13, 7 }
  0x3b   : > { %v2145_v15 = vpop.eup %2144  ;;  %v573_v11 = vadd.f32 1.0, %v2143_v13  ;;  %2158 = vrcp.f32 %v581_v12  ;;  %s2932_s20 = scalar_lea.hbm %s3000_s7, %s1849_s28 }
  0x3c   : > { %v574_v18 = vadd.f32 1.0, %v2145_v15 }
  0x3d   : > { %2160 = vrcp.f32 %v573_v11 }
  0x3e   : > { %2162 = vrcp.f32 %v574_v18 }
  0x3f   : > { %v2147_v24 = vpop.eup %2146  ;;  %2164 = vpow2.f32 %v1788_v17 }
  0x40   : > { %v2149_v29 = vpop.eup %2148  ;;  %v2529_v33 = vmul.f32 %v2147_v24, %v2439_v26  ;;  %2166 = vpow2.f32 %v1789_v20  ;;  %v2115_v26 = vld [vmem:[%s2997_s4 + $0x48] sm:$0xff]   ;;  %v2119_v24 = vld [vmem:[%s2997_s4 + $0x58] sm:$0xff]  }
  0x41   : > { %v2151_v36 = vpop.eup %2150  ;;  %v2533_v37 = vmul.f32 %v2149_v29, %v2442_v27  ;;  %2168 = vrcp.f32 %v582_v23  ;;  %1891 = vmatprep.subr.bf16.mxu1 %v2115_v26 }
  0x42   : > { %v2153_v44 = vpop.eup %2152  ;;  %v2549_v27 = vmul.f32 %v2151_v36, %v2445_v28  ;;  %1892 = vmatpush3.bf16.msra.mxu1 %v2115_v26  ;;  %v969_v62 = vrot.slane %v2529_v33, 1  ;;  %v896_v14 = vrot.slane %v2529_v33, 7 }
  0x43   : > { %v2155_v47 = vpop.eup %2154  ;;  %v2048_v50 = vpack.i.bf16 %v2533_v37, %v2529_v33  ;;  %v2563_v51 = vmul.f32 %v2153_v44, %v2449_v30  ;;  %v970_v28 = vrot.slane %v2533_v37, 1  ;;  %1893 = vmatprep.subr.bf16.mxu1 %v2117_v63  ;;  %v897_v18 = vrot.slane %v2533_v37, 7 }
  0x44   : > { %v2157_v54 = vpop.eup %2156  ;;  %v898_v55 = vrot.slane %v2549_v27, 7  ;;  %v971_v56 = vrot.slane %v2549_v27, 1  ;;  %v2578_v30 = vmul.f32 %v2155_v47, %v2452_v31  ;;  %v2118_v31 = vld [vmem:[%s2997_s4 + $0x28] sm:$0xff]  }
  0x45   : > { %v2159_v59 = vpop.eup %2158  ;;  %2049 = vrot.lane.b32.xlu0 %v2048_v50, %s2270_s22  ;;  %v899_v60 = vrot.slane %v2563_v51, 7  ;;  %v2053_v61 = vpack.i.bf16 %v2563_v51, %v2549_v27  ;;  %v972_v2 = vrot.slane %v2563_v51, 1  ;;  %v2603_v10 = vmul.f32 %v2157_v54, %v2455_v32  ;;  %1915 = vmatprep.subr.bf16.mxu0 %v2118_v31 }
  0x46   : > { %v987_v8 = vsel %vm979_vm0, %v970_v28, %v971_v56  ;;  %v973_v9 = vrot.slane %v2578_v30, 1  ;;  %v2616_v11 = vmul.f32 %v2159_v59, %v2465_v38  ;;  %1894 = vmatpush3.bf16.msra.mxu1 %v2117_v63  ;;  %1916 = vmatpush3.bf16.msra.mxu0 %v2118_v31  ;;  %v628_v63 = vadd.s32 48, %v2398_v3 }
  0x47   : > { %v2161_v6 = vpop.eup %2160  ;;  %2054 = vrot.lane.b32.xlu1 %v2053_v61, %s2270_s22  ;;  %v2611_v12 = vsel %vm906_vm5, %v898_v55, %v899_v60  ;;  %v1019_v22 = vsel %vm2551_vm1, 0.0, %v987_v8  ;;  %v986_v23 = vsel %vm979_vm0, %v971_v56, %v972_v2  ;;  %v974_v34 = vrot.slane %v2603_v10, 1  ;;  %1895 = vmatprep.subr.bf16.mxu1 %v2119_v24 }
  0x48   : > { %v2163_v13 = vpop.eup %2162  ;;  %v609_v15 = vmul.f32 %v2161_v6, %v2486_v48  ;;  %v988_v48 = vsel %vm979_vm0, %v969_v62, %v970_v28  ;;  %v985_v33 = vsel %vm979_vm0, %v972_v2, %v973_v9  ;;  %v975_v43 = vrot.slane %v2616_v11, 1  ;;  %1925 = vmatprep.subr.bf16.mxu0 %v2656_v35 }
  0x49   : > { %v2165_v17 = vpop.eup %2164  ;;  %v610_v19 = vmul.f32 %v2163_v13, %v2489_v49  ;;  %v2063_v45 = vpack.i.bf16 %v1019_v22, %v988_v48  ;;  %v1021_v52 = vsel %vm2567_vm2, 0.0, %v985_v33  ;;  %v2675_v28 = vsel %vm906_vm5, %v897_v18, %v898_v55 }
  0x4a   : > { %v2167_v20 = vpop.eup %2166  ;;  %v2636_v21 = vsel %vm2591_vm4, 0.0, %v609_v15  ;;  %v583_v49 = vadd.f32 1.0, %v2165_v17  ;;  %1896 = vmatpush3.bf16.msra.mxu1 %v2119_v24  ;;  %v947_v58 = vsel %vm2622_vm7, 0.0, %v2675_v28  ;;  %v983_v27 = vsel %vm979_vm0, %v974_v34, %v975_v43 }
  0x4b   : > { %v727_v25 = vsel %vm2591_vm4, 0.0, %v610_v19  ;;  %v967_v29 = vrot.slane %v2636_v21, 1  ;;  %v2169_v36 = vpop.eup %2168  ;;  %v894_v44 = vrot.slane %v2636_v21, 7  ;;  %v584_v46 = vadd.f32 1.0, %v2167_v20  ;;  %1945 = vmatprep.subr.bf16.mxu1 %v2656_v35 }
  0x4c   : > { %v895_v37 = vrot.slane %v727_v25, 7  ;;  %v968_v26 = vrot.slane %v727_v25, 1  ;;  %v2058_v42 = vpack.i.bf16 %v727_v25, %v2636_v21  ;;  %2170 = vrcp.f32 %v583_v49 }
  0x4d   : > { %v2680_v56 = vmul.f32 %v2169_v36, %v2472_v40  ;;  %2172 = vrcp.f32 %v584_v46  ;;  %v2692_v55 = vsel %vm906_vm5, %v896_v14, %v897_v18  ;;  %v2073_v57 = vpack.i.bf16 %v1021_v52, %v986_v23 }
  0x4e   : > { %2059 = vrot.lane.b32.xlu0 %v2058_v42, %s2270_s22  ;;  %v989_v47 = vsel %vm979_vm0, %v968_v26, %v969_v62  ;;  %v990_v50 = vsel %vm979_vm0, %v967_v29, %v968_v26  ;;  %v2696_v40 = vsel %vm906_vm5, %v895_v37, %v896_v14  ;;  %v2078_v59 = vpack.i.bf16 %v2603_v10, %v2578_v30 }
  0x4f   : > { %v1017_v54 = vsel %vm2573_vm3, 0.0, %v989_v47  ;;  %v945_v61 = vsel %vm2630_vm8, 0.0, %v2696_v40  ;;  %v2707_v62 = vsel %vm906_vm5, %v894_v44, %v895_v37  ;;  %v900_v31 = vrot.slane %v2578_v30, 7 }
  0x50   : > { %v2068_v53 = vpack.i.bf16 %v1017_v54, %v990_v50  ;;  %v901_v0 = vrot.slane %v2603_v10, 7  ;;  %v984_v2 = vsel %vm979_vm0, %v973_v9, %v974_v34  ;;  %v1023_v6 = vsel %vm2618_vm6, 0.0, %v983_v27 }
  0x51   : > { %v902_v8 = vrot.slane %v2616_v11, 7  ;;  %v903_v13 = vrot.slane %v2680_v56, 7  ;;  %v784_v14 = vand.u32 15, %v628_v63  ;;  %v2731_v30 = vsel %vm906_vm5, %v899_v60, %v900_v31 }
  0x52   : > { %2064 = vrot.lane.b32.xlu0 %v2063_v45, %s2271_s30  ;;  %2069 = vrot.lane.b32.xlu1 %v2068_v53, %s2271_s30  ;;  %v2725_v15 = vsel %vm906_vm5, %v900_v31, %v901_v0  ;;  %v798_v9 = vand.u32 15, %v630_v1  ;;  %v805_v10 = vand.u32 15, %v2536_v39  ;;  %v819_v32 = vand.u32 15, %v2539_v41 }
  0x53   : > { %v2737_v17 = vsel %vm906_vm5, %v902_v8, %v903_v13  ;;  %v2741_v18 = vsel %vm906_vm5, %v901_v0, %v902_v8  ;;  %v2083_v51 = vpack.i.bf16 %v1023_v6, %v984_v2  ;;  %v2088_v60 = vpack.i.bf16 %v2680_v56, %v2616_v11 }
  0x54   : > { %vm2747_vm9 = vcmp.eq.s32.totalorder %v784_v14, 0  ;;  %vm2751_vm10 = vcmp.eq.s32.totalorder %v798_v9, 0  ;;  %v976_v48 = vrot.slane %v2680_v56, 1  ;;  %v742_v49 = vand.u32 15, %v2398_v3 }
  0x55   : > { %v949_v20 = vsel %vm2747_vm9, 0.0, %v2731_v30  ;;  %v951_v22 = vsel %vm2751_vm10, 0.0, %v2741_v18  ;;  %vm964_vm12 = vcmp.eq.s32.totalorder %v805_v10, 15  ;;  %vm2773_vm13 = vcmp.eq.s32.totalorder %v819_v32, 15 }
  0x56   : > { %2074 = vrot.lane.b32.xlu1 %v2073_v57, %s2271_s30  ;;  %2079 = vrot.lane.b32.xlu0 %v2078_v59, %s2270_s22  ;;  %v2171_v19 = vpop.eup %2170  ;;  %v982_v34 = vsel %vm979_vm0, %v975_v43, %v976_v48  ;;  %vm2777_vm14 = vcmp.eq.s32.totalorder %v742_v49, 0  ;;  %v632_v26 = vadd.s32 80, %v2398_v3  ;;  %vm1101_vm1 = vcmask 523264  }
  0x57   : > { %v619_v23 = vmul.f32 %v2171_v19, %v2502_v4  ;;  %v2173_v24 = vpop.eup %2172  ;;  %vm1196_vm2 = vcmask 785408  }
  0x58   : > { %v620_v25 = vmul.f32 %v2173_v24, %v2505_v7  ;;  %v812_v43 = vand.u32 15, %v632_v26 }
  0x59   : > { %v736_v5 = vsel %vm677_vm11, 0.0, %v619_v23 }
  0x5a   : > { %2084 = vrot.lane.b32.xlu1 %v2083_v51, %s2271_s30  ;;  %2089 = vrot.lane.b32.xlu0 %v2088_v60, %s2270_s22  ;;  %v977_v33 = vrot.slane %v736_v5, 1  ;;  %v737_v4 = vsel %vm677_vm11, 0.0, %v620_v25  ;;  %v904_v42 = vrot.slane %v736_v5, 7  ;;  %vm2803_vm15 = vcmp.eq.s32.totalorder %v812_v43, 0  ;;  %v2122_v43 = vld [vmem:[%s2997_s4 + $0x70] sm:$0xff]  }
  0x5b   : > { %v905_v45 = vrot.slane %v737_v4, 7  ;;  %v978_v11 = vrot.slane %v737_v4, 1  ;;  %v2098_v46 = vpack.i.bf16 %v737_v4, %v736_v5 }
  0x5c   : > { %v981_v7 = vsel %vm979_vm0, %v976_v48, %v977_v33  ;;  %v2786_v50 = vsel %vm906_vm5, %v903_v13, %v904_v42 }
  0x5d   : > { %v1025_v47 = vsel %vm964_vm12, 0.0, %v981_v7  ;;  %v980_v54 = vsel %vm979_vm0, %v977_v33, %v978_v11  ;;  %v991_v56 = vsel %vm979_vm0, %v978_v11, %v967_v29  ;;  %v918_v53 = vsel %vm906_vm5, %v905_v45, %v894_v44 }
  0x5e   : > { %v2093_v52 = vpack.i.bf16 %v1025_v47, %v982_v34  ;;  %2099 = vrot.lane.b32.xlu0 %v2098_v46, %s2270_s22  ;;  %v1027_v27 = vsel %vm2773_vm13, 0.0, %v991_v56  ;;  %v943_v57 = vsel %vm2777_vm14, 0.0, %v918_v53  ;;  %v2809_v63 = vsel %vm906_vm5, %v904_v42, %v905_v45  ;;  %s2905_s22 = sshll.u32 %s427_s23, 6 }
  0x5f   : > { %v2103_v21 = vpack.i.bf16 %v1027_v27, %v980_v54  ;;  %v953_v29 = vsel %vm2803_vm15, 0.0, %v2786_v50  ;;  %vm1092_vm0 = vcmask 261120   ;;  %v2123_v54 = vld [vmem:[%s2997_s4 + $0x78] sm:$0xff]   ;;  %s429_s27 = scalar_lea.vmem [#allocation2], %s2905_s22 }
  0x60   : > { %2094 = vrot.lane.b32.xlu1 %v2093_v52, %s2271_s30  ;;  %s1580_s10 = sshll.u32 %s429_s27, 4  ;;  %s2934_s10 = int_to_ptr.vmem [resolvable:$true] %s1580_s10 }
  0x61   : > { %s2174_s29 = scalar_lea.vmem %s2934_s10, 1024 }
  0x62   : > { %p2175_p6 = scmp.ne.s32.totalorder %s2934_s10, %s2174_s29 }
  0x64   : > { %2104 = vrot.lane.b32.xlu1 %v2103_v21, %s2271_s30  ;;  %s2941_s30 = scalar_lea.sflag [#allocation3], %s427_s23  ;;  %p2176_p7 = pnand %p2175_p6, %p2366_p3 }
  0x66   : > { %p2177_p9 = pneg %p2176_p7 }
  0xb7   : > { %v2050_v44 = vpop.permute.xlu0 %2049 }
  0xb8   : > { %v2052_v6 = vunpack.i.h.bf16 %v2050_v44  ;;  %v2051_v8 = vunpack.i.l.bf16 %v2050_v44 }
  0xb9   : > { %v2055_v31 = vpop.permute.xlu1 %2054 }
  0xba   : > { %v2057_v19 = vunpack.i.h.bf16 %v2055_v31  ;;  %v2056_v48 = vunpack.i.l.bf16 %v2055_v31  ;;  %v1095_v23 = vsel %vm1092_vm0, %v945_v61, %v2051_v8  ;;  %v1096_v49 = vsel %vm1092_vm0, %v2692_v55, %v2052_v6  ;;  %v2121_v55 = vld [vmem:[%s2997_s4 + $0x68] sm:$0xff]  }
  0xbc   : > { %v1097_v61 = vsel %vm1092_vm0, %v947_v58, %v2056_v48  ;;  %v1098_v42 = vsel %vm1092_vm0, %v2611_v12, %v2057_v19 }
  0xc0   : > { %v2060_v0 = vpop.permute.xlu0 %2059 }
  0xc1   : > { %v2062_v1 = vunpack.i.h.bf16 %v2060_v0  ;;  %v2061_v2 = vunpack.i.l.bf16 %v2060_v0 }
  0xc3   : > { %v1093_v14 = vsel %vm1092_vm0, %v943_v57, %v2061_v2  ;;  %v1094_v9 = vsel %vm1092_vm0, %v2707_v62, %v2062_v1 }
  0xc4   : > { %v2065_v3 = vpop.permute.xlu0 %2064  ;;  %v2070_v13 = vpop.permute.xlu1 %2069 }
  0xc5   : > { %v2067_v10 = vunpack.i.h.bf16 %v2065_v3  ;;  %v2066_v32 = vunpack.i.l.bf16 %v2065_v3  ;;  %v2072_v51 = vunpack.i.h.bf16 %v2070_v13  ;;  %v2071_v60 = vunpack.i.l.bf16 %v2070_v13  ;;  %v2125_v3 = vld [vmem:[%s2997_s4 + $0x88] sm:$0xff]  }
  0xc7   : > { %v1104_v24 = vsel %vm1101_vm1, %v1095_v23, %v2066_v32  ;;  %v1105_v5 = vsel %vm1101_vm1, %v1096_v49, %v2067_v10  ;;  %v1102_v62 = vsel %vm1101_vm1, %v1093_v14, %v2071_v60  ;;  %v1103_v25 = vsel %vm1101_vm1, %v1094_v9, %v2072_v51 }
  0xc8   : > { %v2075_v33 = vpop.permute.xlu1 %2074  ;;  %v1111_v34 = vpack.c.bf16 %v1105_v5, %v1104_v24  ;;  %v1110_v36 = vpack.c.bf16 %v1103_v25, %v1102_v62  ;;  %v2080_v4 = vpop.permute.xlu0 %2079 }
  0xc9   : > { %v2077_v38 = vunpack.i.h.bf16 %v2075_v33  ;;  %v2076_v37 = vunpack.i.l.bf16 %v2075_v33  ;;  %v2082_v40 = vunpack.i.h.bf16 %v2080_v4  ;;  %v2081_v26 = vunpack.i.l.bf16 %v2080_v4 }
  0xca   : > { %1897 = vmatprep.mubr.msk.bf16.mxu1 %vm1196_vm2, %v1111_v34  ;;  %1917 = vmatprep.mubr.msk.bf16.mxu0 %vm1196_vm2, %v1110_v36 }
  0xcb   : > { %v1107_v7 = vsel %vm1101_vm1, %v1098_v42, %v2077_v38  ;;  %v1106_v45 = vsel %vm1101_vm1, %v1097_v61, %v2076_v37  ;;  %1918 = vmatmul.mubr.msk.bf16.vlgmr.msra.gmra.mrb[0].mxu0 %vm1196_vm2, %v1111_v34  ;;  %v1100_v16 = vsel %vm1092_vm0, %v2725_v15, %v2082_v40  ;;  %v1099_v12 = vsel %vm1092_vm0, %v949_v20, %v2081_v26  ;;  %v1844_v34 = vld [vmem:[%s2998_s5] ss:$0 sm:$0xff]  ;;  %v1541_v38 = vld [vmem:[%s2901_s11 + $0x10] sm:$0xff] }
  0xcc   : > { %v1112_v11 = vpack.c.bf16 %v1107_v7, %v1106_v45  ;;  %1926 = vmatpush3.bf16.msra.mxu0 %v2656_v35  ;;  %v2085_v28 = vpop.permute.xlu1 %2084  ;;  %v2090_v58 = vpop.permute.xlu0 %2089 }
  0xcd   : > { %v2087_v46 = vunpack.i.h.bf16 %v2085_v28  ;;  %v2086_v47 = vunpack.i.l.bf16 %v2085_v28  ;;  %1927 = vmatprep.subr.bf16.mxu0 %v2121_v55  ;;  %v2092_v39 = vunpack.i.h.bf16 %v2090_v58  ;;  %v2091_v20 = vunpack.i.l.bf16 %v2090_v58 }
  0xce   : > { %1898 = vmatmul.mubr.msk.bf16.vlgmr.msra.gmra.mrb[0].mxu1 %vm1196_vm2, %v1112_v11  ;;  %1921 = vmatprep.mubr.msk.bf16.mxu0 %vm1196_vm2, %v1112_v11 }
  0xcf   : > { %v1109_v15 = vsel %vm1101_vm1, %v1100_v16, %v2087_v46  ;;  %v1108_v30 = vsel %vm1101_vm1, %v1099_v12, %v2086_v47  ;;  %1951 = vmatpush3.bf16.msra.mxu1 %v2656_v35  ;;  %v1143_v53 = vsel %vm1092_vm0, %v2737_v17, %v2092_v39  ;;  %v1142_v35 = vsel %vm1092_vm0, %v951_v22, %v2091_v20  ;;  %v2124_v17 = vld [vmem:[%s2997_s4 + $0x80] sm:$0xff]   ;;  %v1540_v47 = vld [vmem:[%s2901_s11 + $0x8] sm:$0xff] }
  0xd0   : > { %v1113_v52 = vpack.c.bf16 %v1109_v15, %v1108_v30  ;;  %1928 = vmatpush3.bf16.msra.mxu0 %v2121_v55  ;;  %1946 = vmatprep.subr.bf16.mxu1 %v2121_v55  ;;  %v2100_v56 = vpop.permute.xlu0 %2099 }
  0xd1   : > { %1929 = vmatprep.subr.bf16.mxu0 %v2122_v43  ;;  %v2102_v57 = vunpack.i.h.bf16 %v2100_v56  ;;  %v2101_v21 = vunpack.i.l.bf16 %v2100_v56 }
  0xd2   : > { %1901 = vmatprep.mubr.msk.bf16.mxu1 %vm1196_vm2, %v1113_v52  ;;  %v2095_v27 = vpop.permute.xlu1 %2094 }
  0xd3   : > { %1952 = vmatpush3.bf16.msra.mxu1 %v2121_v55  ;;  %1922 = vmatmul.mubr.msk.bf16.gmra.mrb[4].mxu0 %vm1196_vm2, %v1113_v52  ;;  %v2097_v44 = vunpack.i.h.bf16 %v2095_v27  ;;  %v2096_v31 = vunpack.i.l.bf16 %v2095_v27  ;;  %v1395_v0 = vsel %vm1092_vm0, %v2809_v63, %v2102_v57  ;;  %v1394_v1 = vsel %vm1092_vm0, %v953_v29, %v2101_v21  ;;  %v1539_v55 = vld [vmem:[%s2901_s11] sm:$0xff]  ;;  %v1546_v57 = vld [vmem:[%s2901_s11 + $0x38] sm:$0xff] }
  0xd4   : > { %1930 = vmatpush3.bf16.msra.mxu0 %v2122_v43  ;;  %1937 = vmatprep.mubr.msk.bf16.mxu0 %vm1196_vm2, %v1112_v11  ;;  %v1542_v11 = vld [vmem:[%s2901_s11 + $0x18] sm:$0xff] }
  0xd5   : > { %1947 = vmatprep.subr.bf16.mxu1 %v2122_v43  ;;  %1931 = vmatprep.subr.bf16.mxu0 %v2123_v54  ;;  %v1145_v18 = vsel %vm1101_vm1, %v1143_v53, %v2097_v44  ;;  %v1144_v41 = vsel %vm1101_vm1, %v1142_v35, %v2096_v31 }
  0xd6   : > { %v1146_v22 = vpack.c.bf16 %v1145_v18, %v1144_v41  ;;  %v2105_v2 = vpop.permute.xlu1 %2104  ;;  %v1544_v18 = vld [vmem:[%s2901_s11 + $0x28] sm:$0xff] }
  0xd7   : > { %1953 = vmatpush3.bf16.msra.mxu1 %v2122_v43  ;;  %v2107_v6 = vunpack.i.h.bf16 %v2105_v2  ;;  %v2106_v8 = vunpack.i.l.bf16 %v2105_v2  ;;  %v1545_v43 = vld [vmem:[%s2901_s11 + $0x30] sm:$0xff] }
  0xd8   : > { %1932 = vmatpush3.bf16.msra.mxu0 %v2123_v54  ;;  %1948 = vmatprep.subr.bf16.mxu1 %v2123_v54 }
  0xd9   : > { %1902 = vmatmul.mubr.msk.bf16.gmra.mrb[4].mxu1 %vm1196_vm2, %v1146_v22  ;;  %1933 = vmatprep.subr.bf16.mxu0 %v2124_v17  ;;  %v1397_v59 = vsel %vm1101_vm1, %v1395_v0, %v2107_v6  ;;  %v1396_v50 = vsel %vm1101_vm1, %v1394_v1, %v2106_v8 }
  0xda   : > { %1941 = vmatprep.mubr.msk.bf16.mxu1 %vm1196_vm2, %v1146_v22  ;;  %v1398_v63 = vpack.c.bf16 %v1397_v59, %v1396_v50 }
  0xdb   : > { %1954 = vmatpush3.bf16.msra.mxu1 %v2123_v54  ;;  %v1543_v54 = vld [vmem:[%s2901_s11 + $0x20] sm:$0xff]  ;;  %s2272_s11 = smov [#allocation2]  }
  0xdc   : > { %1934 = vmatpush3.bf16.msra.mxu0 %v2124_v17  ;;  %1949 = vmatprep.subr.bf16.mxu1 %v2124_v17  ;;  %s2178_s22 = sshll.u32 %s2272_s11, 4  ;;  %s2179_s22 = int_to_ptr.vmem [resolvable:$false] %s2178_s22 }
  0xdd   : > { %1935 = vmatprep.subr.bf16.mxu0 %v2125_v3  ;;  %s2180_s9 = scalar_lea.vmem %s2179_s22, 2048  ;;  %p2181_p10 = scmp.lt.s32.totalorder %s2934_s10, %s2179_s22 }
  0xde   : > { %p2182_p11 = scmp.lt.s32.totalorder %s2180_s9, %s2174_s29 }
  0xdf   : > { %1955 = vmatpush3.bf16.msra.mxu1 %v2124_v17 }
  0xe0   : > { %1936 = vmatpush3.bf16.msra.mxu0 %v2125_v3  ;;  %1950 = vmatprep.subr.bf16.mxu1 %v2125_v3  ;;  %p2183_p12 = por %p2182_p11, %p2181_p10 }
  0xe2   : > { %p2184_p13 = pnand %p2183_p12, %p2177_p9 }
  0xe3   : > { %1956 = vmatpush3.bf16.msra.mxu1 %v2125_v3  ;;  %1938 = vmatmul.mubr.msk.bf16.vlgmr.msra.gmra.mrb[0].mxu0 %vm1196_vm2, %v1113_v52 }
  0xe6   : > { %1942 = vmatmul.mubr.msk.bf16.vlgmr.msra.gmra.mrb[8].mxu1 %vm1196_vm2, %v1398_v63 }
 0x1a1   : > { %v1899_v29 = vpop.f32.mrb[0].mxu1 }
 0x1a2   : > { %v1243_v13 = vpop.f32.mrb[1].mxu1 }
 0x1a3   : > { %v1900_v14 = vpop.f32.mrb[2].mxu1 }
 0x1a4   : > { %v1246_v9 = vpop.f32.mrb[3].mxu1 }
 0x1a6   : > { %v1923_v10 = vpop.f32.mrb[4].mxu0 }
 0x1a7   : > { %v1363_v32 = vpop.f32.mrb[5].mxu0 }
 0x1a8   : > { %v1924_v51 = vpop.f32.mrb[6].mxu0 }
 0x1a9   : > { %v1366_v60 = vpop.f32.mrb[7].mxu0 }
 0x1ac   : > { %v1903_v19 = vpop.f32.mrb[4].mxu1 }
 0x1ad   : > { %v1372_v48 = vadd.f32 %v1923_v10, %v1903_v19  ;;  %v1259_v23 = vpop.f32.mrb[5].mxu1 }
 0x1ae   : > { %v1364_v49 = vadd.f32 %v1363_v32, %v1259_v23  ;;  %v1904_v24 = vpop.f32.mrb[6].mxu1 }
 0x1af   : > { %v1375_v5 = vadd.f32 %v1924_v51, %v1904_v24  ;;  %v1262_v62 = vpop.f32.mrb[7].mxu1 }
 0x1b0   : > { %v1367_v25 = vadd.f32 %v1366_v60, %v1262_v62 }
 0x1b6   : > { %v1939_v33 = vpop.f32.mrb[0].mxu0 }
 0x1b7   : > { %v1957_v36 = vadd.f32 %v1939_v33, %v1899_v29  ;;  %v1485_v4 = vpop.f32.mrb[1].mxu0 }
 0x1b8   : > { %v1958_v37 = vadd.f32 %v1485_v4, %v1243_v13  ;;  %v1940_v40 = vpop.f32.mrb[2].mxu0 }
 0x1b9   : > { %v1533_v26 = vadd.f32 %v1957_v36, %v1844_v34  ;;  %v1959_v61 = vadd.f32 %v1940_v40, %v1900_v14  ;;  %v1488_v42 = vpop.f32.mrb[3].mxu0  ;;  %v1943_v7 = vpop.f32.mrb[8].mxu1 }
 0x1ba   : > { %v1531_v45 = vadd.f32 %v1958_v37, %v1844_v34  ;;  %v1960_v16 = vadd.f32 %v1488_v42, %v1246_v9  ;;  %v1522_v12 = vadd.f32 %v1943_v7, %v1372_v48  ;;  %v1501_v28 = vpop.f32.mrb[9].mxu1 }
 0x1bb   : > { %v1549_v58 = vadd.f32 %v1541_v38, %v1533_v26  ;;  %v1534_v46 = vadd.f32 %v1959_v61, %v1844_v34  ;;  %v1520_v15 = vadd.f32 %v1501_v28, %v1364_v49  ;;  %v1944_v30 = vpop.f32.mrb[10].mxu1 }
 0x1bc   : > { %v1547_v39 = vadd.f32 %v1539_v55, %v1531_v45  ;;  %v1532_v20 = vadd.f32 %v1960_v16, %v1844_v34  ;;  %v1537_v52 = vadd.f32 %v1844_v34, %v1522_v12  ;;  %v1523_v56 = vadd.f32 %v1944_v30, %v1375_v5  ;;  %v1504_v53 = vpop.f32.mrb[11].mxu1 }
 0x1bd   : > { %1557 = vst.msk [vmem:[%s429_s27 + $0x10] sm:$0xff] %vm1092_vm0, %v1549_v58  ;;  %v1550_v35 = vadd.f32 %v1542_v11, %v1534_v46  ;;  %v1535_v27 = vadd.f32 %v1844_v34, %v1520_v15  ;;  %v1521_v21 = vadd.f32 %v1504_v53, %v1367_v25 }
 0x1be   : > { %1555 = vst.msk [vmem:[%s429_s27] sm:$0xff] %vm1092_vm0, %v1547_v39  ;;  %v1548_v44 = vadd.f32 %v1540_v47, %v1532_v20  ;;  %v1553_v31 = vadd.f32 %v1545_v43, %v1537_v52  ;;  %v1538_v17 = vadd.f32 %v1844_v34, %v1523_v56 }
 0x1bf   : > { %1558 = vst.msk [vmem:[%s429_s27 + $0x18] sm:$0xff] %vm1092_vm0, %v1550_v35  ;;  %v1551_v41 = vadd.f32 %v1543_v54, %v1535_v27  ;;  %v1536_v22 = vadd.f32 %v1844_v34, %v1521_v21 }
 0x1c0   : > { %1556 = vst.msk [vmem:[%s429_s27 + $0x8] sm:$0xff] %vm1092_vm0, %v1548_v44  ;;  %1561 = vst.msk [vmem:[%s429_s27 + $0x30] sm:$0xff] %vm1092_vm0, %v1553_v31  ;;  %v1554_v0 = vadd.f32 %v1546_v57, %v1538_v17 }
 0x1c1   : > { %1559 = vst.msk [vmem:[%s429_s27 + $0x20] sm:$0xff] %vm1092_vm0, %v1551_v41  ;;  %v1552_v1 = vadd.f32 %v1544_v18, %v1536_v22 }
 0x1c2   : > { %1562 = vst.msk [vmem:[%s429_s27 + $0x38] sm:$0xff] %vm1092_vm0, %v1554_v0 }
 0x1c3   : > { %1560 = vst.msk [vmem:[%s429_s27 + $0x28] sm:$0xff] %vm1092_vm0, %v1552_v1 }
 0x1c4   : > { %2187 = shalt.err (!%p2184_p13)
}
 0x1c5   : > { %s2188_s23 = scalar_lea.hbm %s2932_s20, 1024  ;;  %s2192_s16 = scalar_lea.hbm %s3000_s7, 8192 }
 0x1c6   : > { %p2189_p0 = scmp.ne.s32.totalorder %s2932_s20, %s2188_s23  ;;  %p2193_p4 = scmp.lt.u32.totalorder %s2932_s20, %s3000_s7 }
 0x1c7   : > { %p2194_p5 = scmp.lt.u32.totalorder %s2192_s16, %s2188_s23  ;;  %p2196_p7 = scmp.lt.u32.totalorder %s2188_s23, %s2932_s20 }
 0x1c8   : > { %p2190_p1 = pnand %p2189_p0, %p2366_p3 }
 0x1c9   : > { %p2195_p6 = por %p2194_p5, %p2193_p4 }
 0x1ca   : > { %p2191_p2 = pneg %p2190_p1 }
 0x1cb   : > { %p2197_p9 = por %p2196_p7, %p2195_p6 }
 0x1cd   : > { %p2198_p10 = pnand %p2197_p9, %p2191_p2 }
 0x1cf   : > { %2201 = shalt.err (!%p2198_p10)
}
 0x1d0   : > { %s2273_s28 = smov 128   ;;  %s2274_s17 = smov 8  }
 0x1d1   : > { %1973 = dma.vmem_to_hbm [thread:$0]  (%p2366_p3), %s2934_s10, 1024, %s2932_s20, %s2941_s30, %s2273_s28, %s2273_s28, %s2274_s17  }
 0x1d2 PF: > { %p1979_p11 = scmp.ge.s32.totalorder %s2268_s8, 2  ;;  %s1595_s21 = sand.u32 1, %s2240_s24  }
 0x1d3   : > { %s1596_s29 = scalar_lea.sflag [#allocation3], %s1595_s21 }
 0x1d4   : > { %p1976_p12 = pnand %p1979_p11, %p2375_p8 }
 0x1d6   : > { %2235 = dma.done.wait (!%p1976_p12), %s1596_s29, 1024  }
 0x1d7   : > { %2237 = vsyncadd (!%p1976_p12), %s1596_s29, 4294966272  ;;  %s20_s8 = sadd.s32 1, %s2268_s8   ;;  %s3036_s27 = sld [smem:[#allocation5_spill]] }
 0x1d8   : > { %p17_p13 = scmp.ge.s32.totalorder %s20_s8, 10   ;;  %s3037_s28 = sld [smem:[#allocation6_spill]] }
 0x1d9   : > { %s3038_s29 = sld [smem:[#allocation7_spill]]  ;;  %s3039_s30 = sld [smem:[#allocation8_spill]] }
 0x1da   : > { %s3040_s24 = smov %s2244_s25  ;;  %s3041_s25 = smov %s2248_s26 }
 0x1db   : > { %s3042_s26 = smov %s2384_s19  ;;  %19 = sbr.rel (!%p17_p13) target bundleno = 5 (0x5), region = 97 }
 0x1e2   :  { %1601 = vsyncpa [#allocation3], 1 }
 0x1e3   :  { %1603 = vsyncpa [#allocation3 + $0x1], 1 }

</bundles_post_ra>
